<compile_context>
chip_gen: v7x
topology: tpu7x:2x2x1
jax: 0.10.0
libtpu: 0.0.40
codegen_flags: <defaults>
</compile_context>

<pallas_src>
import functools
import math

import jax
import jax.numpy as jnp
from jax import lax
from jax.experimental import pallas as pl
from jax.experimental.pallas import tpu as pltpu

F32 = jnp.float32

# ----------------------------- padded dimensions ----------------------------
E = 100          # transformer embed dim (true)
EP = 128         # embed dim padded to lane width
FF = 128         # dim_feedforward (already lane-aligned)
FP = 128         # ball feature dim padded
NBP = 128        # nb_classes padded
BFP = 1024       # backbone feature dim 1000 padded
KCP = 32         # im2col patch dim 27 padded
STEM_CH = 32     # stand-in conv stem channels
TM = 128         # M-tile for the stem matmul grid


# ----------------------------- Pallas kernels ------------------------------
def _image_path_kernel(cols_ref, pool_ref, sw_ref, sb_ref,
                       bbw_ref, bbb_ref, cw_ref, cb_ref,
                       o_ref, acc_ref):
    """Fused image path: stem matmul+SiLU -> GAP (as matmul) -> bb_fc -> cnn_fc.

    Grid axis 0 tiles the M = B*OH*OW rows of the im2col matrix; the per-batch
    pooled sums accumulate in VMEM scratch; the two small FCs run on the last
    grid step only.
    """
    m = pl.program_id(0)

    @pl.when(m == 0)
    def _():
        acc_ref[...] = jnp.zeros_like(acc_ref)

    stem = jnp.dot(cols_ref[...], sw_ref[...], preferred_element_type=jnp.float32)
    stem = stem + sb_ref[...]
    stem = stem * jax.nn.sigmoid(stem)                     # SiLU (f32 on EUP)
    # pool_ref rows carry 1/P for rows of batch b, 0 elsewhere -> per-batch mean.
    acc_ref[...] += jnp.dot(pool_ref[...], stem, preferred_element_type=jnp.float32)

    @pl.when(m == pl.num_programs(0) - 1)
    def _():
        feats = jnp.dot(acc_ref[...], bbw_ref[...],
                        preferred_element_type=jnp.float32) + bbb_ref[...]
        img = jnp.dot(feats, cw_ref[...],
                      preferred_element_type=jnp.float32) + cb_ref[...]
        o_ref[...] = img.astype(o_ref.dtype)


def _ball_path_kernel(ball_ref, pre_w, pre_b,
                      wq, bq, wk, bk, wv, bv, wo, bo,
                      ln1_g, ln1_b, ff1_w, ff1_b, ff2_w, ff2_b,
                      ln2_g, ln2_b, bfc_w, bfc_b,
                      o_ref, *, e_true, eps, scale):
    """Fused ball path: pre_fc -> single-head attention -> add+LN1 -> FF(ReLU)
    -> add+LN2 -> ball_fc. Everything stays resident in VMEM (< 1 MiB f32)."""

    def layernorm(h, g_ref, b_ref):
        # Padding lanes of h are exactly zero, so sums over the full 128 lanes
        # equal sums over the true E=100 lanes; divide by the true width.
        s1 = jnp.sum(h, axis=-1, keepdims=True)
        s2 = jnp.sum(h * h, axis=-1, keepdims=True)
        mu = s1 / e_true
        var = s2 / e_true - mu * mu                       # biased var (PyTorch)
        y = (h - mu) * lax.rsqrt(var + eps)
        return y * g_ref[...] + b_ref[...]                # gamma/beta pads = 0

    x = jnp.dot(ball_ref[...], pre_w[...], preferred_element_type=jnp.float32) + pre_b[...]

    q = jnp.dot(x, wq[...], preferred_element_type=jnp.float32) + bq[...]
    k = jnp.dot(x, wk[...], preferred_element_type=jnp.float32) + bk[...]
    v = jnp.dot(x, wv[...], preferred_element_type=jnp.float32) + bv[...]
    # q @ k^T without an explicit transpose: contract lane dim of both.
    s = lax.dot_general(q, k, (((1,), (1,)), ((), ())),
                        preferred_element_type=jnp.float32) * scale
    s = s - jnp.max(s, axis=-1, keepdims=True)
    p = jnp.exp(s)
    p = p * pl.reciprocal(jnp.sum(p, axis=-1, keepdims=True), approx=True)
    ctx = jnp.dot(p, v, preferred_element_type=jnp.float32)
    sa = jnp.dot(ctx, wo[...], preferred_element_type=jnp.float32) + bo[...]

    x = layernorm(x + sa, ln1_g, ln1_b)                   # post-norm

    ff = jnp.dot(x, ff1_w[...], preferred_element_type=jnp.float32) + ff1_b[...]
    ff = jnp.maximum(ff, 0.0)                             # ReLU
    ff = jnp.dot(ff, ff2_w[...], preferred_element_type=jnp.float32) + ff2_b[...]

    x = layernorm(x + ff, ln2_g, ln2_b)

    ballout = jnp.dot(x, bfc_w[...], preferred_element_type=jnp.float32) + bfc_b[...]
    o_ref[...] = ballout.astype(o_ref.dtype)


def _fin_kernel(img_ref, ball_ref, wi_ref, wb_ref, b_ref, o_ref):
    """fin_fc(cat(imgout, ballout)) with the weight split into two padded halves
    so no (B, 2*nb) concat / masked store is ever materialized."""
    out = (jnp.dot(img_ref[...], wi_ref[...], preferred_element_type=jnp.float32)
           + jnp.dot(ball_ref[...], wb_ref[...], preferred_element_type=jnp.float32)
           + b_ref[...])
    o_ref[...] = out.astype(o_ref.dtype)


# ------------------------------ JAX glue ------------------------------------
def im2col_nchw(x, kh, kw, stride, pad):
    """NCHW -> (B*OH*OW, C*KH*KW) rows (batch-major rows)."""
    # TODO(synk): at realistic image sizes replace with lax.conv_general_dilated
    # (or an in-kernel window gather) to avoid materializing the 9x-expanded
    # patch tensor in HBM.
    B, C, H, W = x.shape
    xp = jnp.pad(x, ((0, 0), (0, 0), (pad, pad), (pad, pad)))
    OH = (H + 2 * pad - kh) // stride + 1
    OW = (W + 2 * pad - kw) // stride + 1
    patches = []
    for i in range(kh):
        for j in range(kw):
            patches.append(xp[:, :, i:i + stride * OH:stride,
                               j:j + stride * OW:stride])
    cols = jnp.stack(patches, axis=-1)        # (B, C, OH, OW, KH*KW)
    cols = cols.transpose(0, 2, 3, 1, 4)      # (B, OH, OW, C, KH*KW)
    return cols.reshape(B * OH * OW, C * kh * kw), OH, OW


def _dense(key, fan_in, fan_out, pad_in, pad_out):
    """PyTorch-style uniform init, embedded in a zero-padded (pad_in, pad_out)
    slab so all padding lanes stay exactly zero."""
    kw, kb = jax.random.split(key)
    lim = 1.0 / math.sqrt(fan_in)
    w = jax.random.uniform(kw, (fan_in, fan_out), F32, -lim, lim)
    b = jax.random.uniform(kb, (1, fan_out), F32, -lim, lim)
    wp = jnp.zeros((pad_in, pad_out), F32).at[:fan_in, :fan_out].set(w)
    bp = jnp.zeros((1, pad_out), F32).at[:, :fan_out].set(b)
    return wp, bp


def init_params(key, nb_classes, ball_feat, stem_ch=STEM_CH):
    assert nb_classes <= NBP and ball_feat <= FP
    keys = jax.random.split(key, 12)
    p = {}
    # Stand-in backbone: conv3x3/s2 (3->stem_ch) + SiLU + GAP + FC(stem_ch->1000)
    # TODO(synk): the pretrained EfficientNetV2-S backbone (ImageNet weights) is
    # not replicated; this stand-in produces the same (B, 1000) interface.
    p["stem_w"], p["stem_b"] = _dense(keys[0], 27, stem_ch, KCP, stem_ch)
    p["bb_fc_w"], p["bb_fc_b"] = _dense(keys[1], stem_ch, 1000, stem_ch, BFP)
    p["cnn_fc_w"], p["cnn_fc_b"] = _dense(keys[2], 1000, nb_classes, BFP, NBP)
    p["pre_w"], p["pre_b"] = _dense(keys[3], ball_feat, E, FP, EP)
    # TransformerEncoderLayer(d_model=100, nhead=1, dim_feedforward=128)
    p["wq"], p["bq"] = _dense(keys[4], E, E, EP, EP)
    p["wk"], p["bk"] = _dense(keys[5], E, E, EP, EP)
    p["wv"], p["bv"] = _dense(keys[6], E, E, EP, EP)
    p["wo"], p["bo"] = _dense(keys[7], E, E, EP, EP)
    p["ln1_g"] = jnp.zeros((1, EP), F32).at[:, :E].set(1.0)
    p["ln1_b"] = jnp.zeros((1, EP), F32)
    p["ff1_w"], p["ff1_b"] = _dense(keys[8], E, FF, EP, FF)
    p["ff2_w"], p["ff2_b"] = _dense(keys[9], FF, E, FF, EP)
    p["ln2_g"] = jnp.zeros((1, EP), F32).at[:, :E].set(1.0)
    p["ln2_b"] = jnp.zeros((1, EP), F32)
    p["ball_fc_w"], p["ball_fc_b"] = _dense(keys[10], E, nb_classes, EP, NBP)
    # fin_fc: single Linear(2*nb -> nb) split into image/ball halves.
    kw, kb = jax.random.split(keys[11])
    lim = 1.0 / math.sqrt(2 * nb_classes)
    wf = jax.random.uniform(kw, (2 * nb_classes, nb_classes), F32, -lim, lim)
    bf = jax.random.uniform(kb, (1, nb_classes), F32, -lim, lim)
    p["fin_w_img"] = jnp.zeros((NBP, NBP), F32).at[:nb_classes, :nb_classes].set(wf[:nb_classes])
    p["fin_w_ball"] = jnp.zeros((NBP, NBP), F32).at[:nb_classes, :nb_classes].set(wf[nb_classes:])
    p["fin_b"] = jnp.zeros((1, NBP), F32).at[:, :nb_classes].set(bf)
    return p


def classifier_forward(params, img, ball, *, nb_classes):
    B = img.shape[0]

    # ---- image path (one fused pallas_call, M-tiled grid) -----------------
    cols, OH, OW = im2col_nchw(img, 3, 3, stride=2, pad=1)       # (M, 27)
    M, kc = cols.shape
    P = OH * OW
    Mp = ((M + TM - 1) // TM) * TM
    cols_p = jnp.pad(cols, ((0, Mp - M), (0, KCP - kc)))         # (Mp, 32)
    # Pooling matrix: pool[b, r] = 1/P for rows r of batch b (GAP as a matmul).
    rb = jnp.arange(M) // P
    pool = (rb[None, :] == jnp.arange(B)[:, None]).astype(F32) * (1.0 / P)
    pool = jnp.pad(pool, ((0, 0), (0, Mp - M)))                  # (B, Mp)

    grid_m = Mp // TM
    flops = 2 * (Mp * KCP * STEM_CH + B * Mp * STEM_CH
                 + B * STEM_CH * BFP + B * BFP * NBP)
    bytes_acc = 4 * (Mp * KCP + B * Mp + KCP * STEM_CH + STEM_CH
                     + STEM_CH * BFP + BFP + BFP * NBP + NBP + B * NBP)
    imgout_p = pl.pallas_call(
        _image_path_kernel,
        out_shape=jax.ShapeDtypeStruct((B, NBP), F32),
        grid=(grid_m,),
        in_specs=[
            pl.BlockSpec((TM, KCP), lambda m: (m, 0)),
            pl.BlockSpec((B, TM), lambda m: (0, m)),
            pl.BlockSpec((KCP, STEM_CH), lambda m: (0, 0)),
            pl.BlockSpec((1, STEM_CH), lambda m: (0, 0)),
            pl.BlockSpec((STEM_CH, BFP), lambda m: (0, 0)),
            pl.BlockSpec((1, BFP), lambda m: (0, 0)),
            pl.BlockSpec((BFP, NBP), lambda m: (0, 0)),
            pl.BlockSpec((1, NBP), lambda m: (0, 0)),
        ],
        out_specs=pl.BlockSpec((B, NBP), lambda m: (0, 0)),
        scratch_shapes=[pltpu.VMEM((B, STEM_CH), F32)],
        compiler_params=pltpu.CompilerParams(
            dimension_semantics=("arbitrary",)),
        cost_estimate=pl.CostEstimate(
            flops=flops, transcendentals=Mp * STEM_CH, bytes_accessed=bytes_acc),
    )(cols_p, pool, params["stem_w"], params["stem_b"],
      params["bb_fc_w"], params["bb_fc_b"],
      params["cnn_fc_w"], params["cnn_fc_b"])                    # (B, 128)

    # ---- ball path (one fused pallas_call; attention mixes over B) --------
    ball_p = jnp.pad(ball, ((0, 0), (0, params["pre_w"].shape[0] - ball.shape[1])))
    ballout_p = pl.pallas_call(
        functools.partial(_ball_path_kernel,
                          e_true=float(E), eps=1e-5, scale=1.0 / math.sqrt(E)),
        out_shape=jax.ShapeDtypeStruct((B, NBP), F32),
    )(ball_p, params["pre_w"], params["pre_b"],
      params["wq"], params["bq"], params["wk"], params["bk"],
      params["wv"], params["bv"], params["wo"], params["bo"],
      params["ln1_g"], params["ln1_b"],
      params["ff1_w"], params["ff1_b"], params["ff2_w"], params["ff2_b"],
      params["ln2_g"], params["ln2_b"],
      params["ball_fc_w"], params["ball_fc_b"])                  # (B, 128)

    # ---- fusion (fin_fc over the two branches) -----------------------------
    out_p = pl.pallas_call(
        _fin_kernel,
        out_shape=jax.ShapeDtypeStruct((B, NBP), F32),
    )(imgout_p, ballout_p, params["fin_w_img"], params["fin_w_ball"],
      params["fin_b"])                                           # (B, 128)

    return out_p[:, :nb_classes]


if __name__ == "__main__":
    nb_classes = 5
    B, C, H, W = 4, 3, 16, 16
    ball_feat = 8

    key = jax.random.PRNGKey(0)
    kimg, kball, kparam = jax.random.split(key, 3)
    img = jax.random.normal(kimg, (B, C, H, W), F32)
    ball = jax.random.normal(kball, (B, ball_feat), F32)
    params = init_params(kparam, nb_classes, ball_feat)

    fwd = jax.jit(functools.partial(classifier_forward, nb_classes=nb_classes))
    out = fwd(params, img, ball)
    out = jax.block_until_ready(out)
    assert out.shape == (B, nb_classes)
    assert bool(jnp.all(jnp.isfinite(out)))
    print("KERNEL_OK")
</pallas_src>

<mosaic_0001>
module attributes {stable_mosaic.version = 11 : i64} {
  func.func @_image_path_kernel(%arg0: i32, %arg1: memref<128x32xf32, #tpu.memory_space<vmem>>, %arg2: memref<4x128xf32, #tpu.memory_space<vmem>>, %arg3: memref<32x32xf32, #tpu.memory_space<vmem>>, %arg4: memref<1x32xf32, #tpu.memory_space<vmem>>, %arg5: memref<32x1024xf32, #tpu.memory_space<vmem>>, %arg6: memref<1x1024xf32, #tpu.memory_space<vmem>>, %arg7: memref<1024x128xf32, #tpu.memory_space<vmem>>, %arg8: memref<1x128xf32, #tpu.memory_space<vmem>>, %arg9: memref<4x128xf32, #tpu.memory_space<vmem>>, %arg10: memref<4x32xf32, #tpu.memory_space<vmem>>) attributes {dimension_semantics = [#tpu.dimension_semantics<arbitrary>], iteration_bounds = array<i64: 2>, scalar_prefetch = 0 : i64, scratch_operands = 1 : i64, tpu.core_type = #tpu.core_type<tc>, window_params = [{transform_indices = @transform_0, window_bounds = array<i64: 128, 32>}, {transform_indices = @transform_1, window_bounds = array<i64: 4, 128>}, {pipeline_mode = #tpu.pipeline_mode<synchronous>, transform_indices = @transform_2, window_bounds = array<i64: 32, 32>}, {pipeline_mode = #tpu.pipeline_mode<synchronous>, transform_indices = @transform_3, window_bounds = array<i64: 1, 32>}, {pipeline_mode = #tpu.pipeline_mode<synchronous>, transform_indices = @transform_4, window_bounds = array<i64: 32, 1024>}, {pipeline_mode = #tpu.pipeline_mode<synchronous>, transform_indices = @transform_5, window_bounds = array<i64: 1, 1024>}, {pipeline_mode = #tpu.pipeline_mode<synchronous>, transform_indices = @transform_6, window_bounds = array<i64: 1024, 128>}, {pipeline_mode = #tpu.pipeline_mode<synchronous>, transform_indices = @transform_7, window_bounds = array<i64: 1, 128>}, {pipeline_mode = #tpu.pipeline_mode<synchronous>, transform_indices = @transform_8, window_bounds = array<i64: 4, 128>}]} {
    %c0_i32 = arith.constant 0 : i32
    %0 = arith.cmpi eq, %arg0, %c0_i32 : i32
    %1 = arith.extui %0 : i1 to i32
    %c0_i32_0 = arith.constant 0 : i32
    %2 = arith.cmpi ne, %1, %c0_i32_0 : i32
    scf.if %2 {
      %cst_15 = arith.constant 0.000000e+00 : f32
      %23 = vector.broadcast %cst_15 : f32 to vector<4x32xf32>
      %c0_16 = arith.constant 0 : index
      %c0_17 = arith.constant 0 : index
      %24 = vector.load %arg10[%c0_16, %c0_17] : memref<4x32xf32, #tpu.memory_space<vmem>>, vector<4x32xf32>
      tpu.vector_store %arg10[%c0_16, %c0_17], %23 {strides = array<i32>} : memref<4x32xf32, #tpu.memory_space<vmem>>, vector<4x32xf32>,
    } else {
    }
    %c0 = arith.constant 0 : index
    %c0_1 = arith.constant 0 : index
    %3 = vector.load %arg1[%c0, %c0_1] : memref<128x32xf32, #tpu.memory_space<vmem>>, vector<128x32xf32>
    %c0_2 = arith.constant 0 : index
    %c0_3 = arith.constant 0 : index
    %4 = vector.load %arg3[%c0_2, %c0_3] : memref<32x32xf32, #tpu.memory_space<vmem>>, vector<32x32xf32>
    %cst = arith.constant dense<0.000000e+00> : vector<128x32xf32>
    %5 = tpu.matmul %3, %4, %cst {dimension_numbers = #tpu.dot_dimension_numbers<[1], [0], [0], [1], [0, 0, 1, 1], [], []>} : vector<128x32xf32>, vector<32x32xf32>, vector<128x32xf32> -> vector<128x32xf32>
    %c0_4 = arith.constant 0 : index
    %c0_5 = arith.constant 0 : index
    %6 = vector.load %arg4[%c0_4, %c0_5] : memref<1x32xf32, #tpu.memory_space<vmem>>, vector<1x32xf32>
    %7 = vector.broadcast %6 : vector<1x32xf32> to vector<128x32xf32>
    %8 = arith.addf %5, %7 : vector<128x32xf32>
    %9 = arith.negf %8 : vector<128x32xf32>
    %10 = math.exp %9 : vector<128x32xf32>
    %cst_6 = arith.constant 1.000000e+00 : f32
    %11 = vector.broadcast %cst_6 : f32 to vector<128x32xf32>
    %12 = arith.addf %11, %10 : vector<128x32xf32>
    %13 = arith.divf %11, %12 : vector<128x32xf32>
    %14 = arith.mulf %8, %13 : vector<128x32xf32>
    %c0_7 = arith.constant 0 : index
    %c0_8 = arith.constant 0 : index
    %15 = vector.load %arg10[%c0_7, %c0_8] : memref<4x32xf32, #tpu.memory_space<vmem>>, vector<4x32xf32>
    %c0_9 = arith.constant 0 : index
    %c0_10 = arith.constant 0 : index
    %16 = vector.load %arg2[%c0_9, %c0_10] : memref<4x128xf32, #tpu.memory_space<vmem>>, vector<4x128xf32>
    %cst_11 = arith.constant dense<0.000000e+00> : vector<4x32xf32>
    %17 = tpu.matmul %16, %14, %cst_11 {dimension_numbers = #tpu.dot_dimension_numbers<[1], [0], [0], [1], [0, 0, 1, 1], [], []>} : vector<4x128xf32>, vector<128x32xf32>, vector<4x32xf32> -> vector<4x32xf32>
    %18 = arith.addf %15, %17 : vector<4x32xf32>
    %c0_12 = arith.constant 0 : index
    %c0_13 = arith.constant 0 : index
    %19 = vector.load %arg10[%c0_12, %c0_13] : memref<4x32xf32, #tpu.memory_space<vmem>>, vector<4x32xf32>
    tpu.vector_store %arg10[%c0_12, %c0_13], %18 {strides = array<i32>} : memref<4x32xf32, #tpu.memory_space<vmem>>, vector<4x32xf32>,
    %c1_i32 = arith.constant 1 : i32
    %20 = arith.cmpi eq, %arg0, %c1_i32 : i32
    %21 = arith.extui %20 : i1 to i32
    %c0_i32_14 = arith.constant 0 : i32
    %22 = arith.cmpi ne, %21, %c0_i32_14 : i32
    scf.if %22 {
      %c0_15 = arith.constant 0 : index
      %c0_16 = arith.constant 0 : index
      %23 = vector.load %arg10[%c0_15, %c0_16] : memref<4x32xf32, #tpu.memory_space<vmem>>, vector<4x32xf32>
      %c0_17 = arith.constant 0 : index
      %c0_18 = arith.constant 0 : index
      %24 = vector.load %arg5[%c0_17, %c0_18] : memref<32x1024xf32, #tpu.memory_space<vmem>>, vector<32x1024xf32>
      %cst_19 = arith.constant dense<0.000000e+00> : vector<4x1024xf32>
      %25 = tpu.matmul %23, %24, %cst_19 {dimension_numbers = #tpu.dot_dimension_numbers<[1], [0], [0], [1], [0, 0, 1, 1], [], []>} : vector<4x32xf32>, vector<32x1024xf32>, vector<4x1024xf32> -> vector<4x1024xf32>
      %c0_20 = arith.constant 0 : index
      %c0_21 = arith.constant 0 : index
      %26 = vector.load %arg6[%c0_20, %c0_21] : memref<1x1024xf32, #tpu.memory_space<vmem>>, vector<1x1024xf32>
      %27 = vector.broadcast %26 : vector<1x1024xf32> to vector<4x1024xf32>
      %28 = arith.addf %25, %27 : vector<4x1024xf32>
      %c0_22 = arith.constant 0 : index
      %c0_23 = arith.constant 0 : index
      %29 = vector.load %arg7[%c0_22, %c0_23] : memref<1024x128xf32, #tpu.memory_space<vmem>>, vector<1024x128xf32>
      %cst_24 = arith.constant dense<0.000000e+00> : vector<4x128xf32>
      %30 = tpu.matmul %28, %29, %cst_24 {dimension_numbers = #tpu.dot_dimension_numbers<[1], [0], [0], [1], [0, 0, 1, 1], [], []>} : vector<4x1024xf32>, vector<1024x128xf32>, vector<4x128xf32> -> vector<4x128xf32>
      %c0_25 = arith.constant 0 : index
      %c0_26 = arith.constant 0 : index
      %31 = vector.load %arg8[%c0_25, %c0_26] : memref<1x128xf32, #tpu.memory_space<vmem>>, vector<1x128xf32>
      %32 = vector.broadcast %31 : vector<1x128xf32> to vector<4x128xf32>
      %33 = arith.addf %30, %32 : vector<4x128xf32>
      %c0_27 = arith.constant 0 : index
      %c0_28 = arith.constant 0 : index
      %34 = vector.load %arg9[%c0_27, %c0_28] : memref<4x128xf32, #tpu.memory_space<vmem>>, vector<4x128xf32>
      tpu.vector_store %arg9[%c0_27, %c0_28], %33 {strides = array<i32>} : memref<4x128xf32, #tpu.memory_space<vmem>>, vector<4x128xf32>,
    } else {
    }
    return
  }
  func.func @transform_0(%arg0: i32) -> (i32, i32) {
    %c0_i32 = arith.constant 0 : i32
    %c0_i32_0 = arith.constant 0 : i32
    return %arg0, %c0_i32 : i32, i32
  }
  func.func @transform_1(%arg0: i32) -> (i32, i32) {
    %c0_i32 = arith.constant 0 : i32
    %c0_i32_0 = arith.constant 0 : i32
    return %c0_i32, %arg0 : i32, i32
  }
  func.func @transform_2(%arg0: i32) -> (i32, i32) {
    %c0_i32 = arith.constant 0 : i32
    %c0_i32_0 = arith.constant 0 : i32
    %c0_i32_1 = arith.constant 0 : i32
    return %c0_i32, %c0_i32_0 : i32, i32
  }
  func.func @transform_3(%arg0: i32) -> (i32, i32) {
    %c0_i32 = arith.constant 0 : i32
    %c0_i32_0 = arith.constant 0 : i32
    %c0_i32_1 = arith.constant 0 : i32
    return %c0_i32, %c0_i32_0 : i32, i32
  }
  func.func @transform_4(%arg0: i32) -> (i32, i32) {
    %c0_i32 = arith.constant 0 : i32
    %c0_i32_0 = arith.constant 0 : i32
    %c0_i32_1 = arith.constant 0 : i32
    return %c0_i32, %c0_i32_0 : i32, i32
  }
  func.func @transform_5(%arg0: i32) -> (i32, i32) {
    %c0_i32 = arith.constant 0 : i32
    %c0_i32_0 = arith.constant 0 : i32
    %c0_i32_1 = arith.constant 0 : i32
    return %c0_i32, %c0_i32_0 : i32, i32
  }
  func.func @transform_6(%arg0: i32) -> (i32, i32) {
    %c0_i32 = arith.constant 0 : i32
    %c0_i32_0 = arith.constant 0 : i32
    %c0_i32_1 = arith.constant 0 : i32
    return %c0_i32, %c0_i32_0 : i32, i32
  }
  func.func @transform_7(%arg0: i32) -> (i32, i32) {
    %c0_i32 = arith.constant 0 : i32
    %c0_i32_0 = arith.constant 0 : i32
    %c0_i32_1 = arith.constant 0 : i32
    return %c0_i32, %c0_i32_0 : i32, i32
  }
  func.func @transform_8(%arg0: i32) -> (i32, i32) {
    %c0_i32 = arith.constant 0 : i32
    %c0_i32_0 = arith.constant 0 : i32
    %c0_i32_1 = arith.constant 0 : i32
    return %c0_i32, %c0_i32_0 : i32, i32
  }
}

module attributes {stable_mosaic.version = 11 : i64} {
  func.func @_ball_path_kernel(%arg0: memref<4x128xf32, #tpu.memory_space<vmem>>, %arg1: memref<128x128xf32, #tpu.memory_space<vmem>>, %arg2: memref<1x128xf32, #tpu.memory_space<vmem>>, %arg3: memref<128x128xf32, #tpu.memory_space<vmem>>, %arg4: memref<1x128xf32, #tpu.memory_space<vmem>>, %arg5: memref<128x128xf32, #tpu.memory_space<vmem>>, %arg6: memref<1x128xf32, #tpu.memory_space<vmem>>, %arg7: memref<128x128xf32, #tpu.memory_space<vmem>>, %arg8: memref<1x128xf32, #tpu.memory_space<vmem>>, %arg9: memref<128x128xf32, #tpu.memory_space<vmem>>, %arg10: memref<1x128xf32, #tpu.memory_space<vmem>>, %arg11: memref<1x128xf32, #tpu.memory_space<vmem>>, %arg12: memref<1x128xf32, #tpu.memory_space<vmem>>, %arg13: memref<128x128xf32, #tpu.memory_space<vmem>>, %arg14: memref<1x128xf32, #tpu.memory_space<vmem>>, %arg15: memref<128x128xf32, #tpu.memory_space<vmem>>, %arg16: memref<1x128xf32, #tpu.memory_space<vmem>>, %arg17: memref<1x128xf32, #tpu.memory_space<vmem>>, %arg18: memref<1x128xf32, #tpu.memory_space<vmem>>, %arg19: memref<128x128xf32, #tpu.memory_space<vmem>>, %arg20: memref<1x128xf32, #tpu.memory_space<vmem>>, %arg21: memref<4x128xf32, #tpu.memory_space<vmem>>) attributes {dimension_semantics = [], scalar_prefetch = 0 : i64, scratch_operands = 0 : i64, tpu.core_type = #tpu.core_type<tc>} {
    %c0 = arith.constant 0 : index
    %c0_0 = arith.constant 0 : index
    %0 = vector.load %arg0[%c0, %c0_0] : memref<4x128xf32, #tpu.memory_space<vmem>>, vector<4x128xf32>
    %c0_1 = arith.constant 0 : index
    %c0_2 = arith.constant 0 : index
    %1 = vector.load %arg1[%c0_1, %c0_2] : memref<128x128xf32, #tpu.memory_space<vmem>>, vector<128x128xf32>
    %cst = arith.constant dense<0.000000e+00> : vector<4x128xf32>
    %2 = tpu.matmul %0, %1, %cst {dimension_numbers = #tpu.dot_dimension_numbers<[1], [0], [0], [1], [0, 0, 1, 1], [], []>} : vector<4x128xf32>, vector<128x128xf32>, vector<4x128xf32> -> vector<4x128xf32>
    %c0_3 = arith.constant 0 : index
    %c0_4 = arith.constant 0 : index
    %3 = vector.load %arg2[%c0_3, %c0_4] : memref<1x128xf32, #tpu.memory_space<vmem>>, vector<1x128xf32>
    %4 = vector.broadcast %3 : vector<1x128xf32> to vector<4x128xf32>
    %5 = arith.addf %2, %4 : vector<4x128xf32>
    %c0_5 = arith.constant 0 : index
    %c0_6 = arith.constant 0 : index
    %6 = vector.load %arg3[%c0_5, %c0_6] : memref<128x128xf32, #tpu.memory_space<vmem>>, vector<128x128xf32>
    %cst_7 = arith.constant dense<0.000000e+00> : vector<4x128xf32>
    %7 = tpu.matmul %5, %6, %cst_7 {dimension_numbers = #tpu.dot_dimension_numbers<[1], [0], [0], [1], [0, 0, 1, 1], [], []>} : vector<4x128xf32>, vector<128x128xf32>, vector<4x128xf32> -> vector<4x128xf32>
    %c0_8 = arith.constant 0 : index
    %c0_9 = arith.constant 0 : index
    %8 = vector.load %arg4[%c0_8, %c0_9] : memref<1x128xf32, #tpu.memory_space<vmem>>, vector<1x128xf32>
    %9 = vector.broadcast %8 : vector<1x128xf32> to vector<4x128xf32>
    %10 = arith.addf %7, %9 : vector<4x128xf32>
    %c0_10 = arith.constant 0 : index
    %c0_11 = arith.constant 0 : index
    %11 = vector.load %arg5[%c0_10, %c0_11] : memref<128x128xf32, #tpu.memory_space<vmem>>, vector<128x128xf32>
    %cst_12 = arith.constant dense<0.000000e+00> : vector<4x128xf32>
    %12 = tpu.matmul %5, %11, %cst_12 {dimension_numbers = #tpu.dot_dimension_numbers<[1], [0], [0], [1], [0, 0, 1, 1], [], []>} : vector<4x128xf32>, vector<128x128xf32>, vector<4x128xf32> -> vector<4x128xf32>
    %c0_13 = arith.constant 0 : index
    %c0_14 = arith.constant 0 : index
    %13 = vector.load %arg6[%c0_13, %c0_14] : memref<1x128xf32, #tpu.memory_space<vmem>>, vector<1x128xf32>
    %14 = vector.broadcast %13 : vector<1x128xf32> to vector<4x128xf32>
    %15 = arith.addf %12, %14 : vector<4x128xf32>
    %c0_15 = arith.constant 0 : index
    %c0_16 = arith.constant 0 : index
    %16 = vector.load %arg7[%c0_15, %c0_16] : memref<128x128xf32, #tpu.memory_space<vmem>>, vector<128x128xf32>
    %cst_17 = arith.constant dense<0.000000e+00> : vector<4x128xf32>
    %17 = tpu.matmul %5, %16, %cst_17 {dimension_numbers = #tpu.dot_dimension_numbers<[1], [0], [0], [1], [0, 0, 1, 1], [], []>} : vector<4x128xf32>, vector<128x128xf32>, vector<4x128xf32> -> vector<4x128xf32>
    %c0_18 = arith.constant 0 : index
    %c0_19 = arith.constant 0 : index
    %18 = vector.load %arg8[%c0_18, %c0_19] : memref<1x128xf32, #tpu.memory_space<vmem>>, vector<1x128xf32>
    %19 = vector.broadcast %18 : vector<1x128xf32> to vector<4x128xf32>
    %20 = arith.addf %17, %19 : vector<4x128xf32>
    %cst_20 = arith.constant dense<0.000000e+00> : vector<4x4xf32>
    %21 = tpu.matmul %10, %15, %cst_20 {dimension_numbers = #tpu.dot_dimension_numbers<[1], [1], [0], [0], [0, 0, 1, 0], [], []>} : vector<4x128xf32>, vector<4x128xf32>, vector<4x4xf32> -> vector<4x4xf32>
    %cst_21 = arith.constant 1.000000e-01 : f32
    %22 = vector.broadcast %cst_21 : f32 to vector<4x4xf32>
    %23 = arith.mulf %21, %22 : vector<4x4xf32>
    %cst_22 = arith.constant dense<0xFF800000> : vector<4xf32>
    %24 = vector.multi_reduction <maximumf>, %23, %cst_22 [1] : vector<4x4xf32> to vector<4xf32>
    %25 = vector.shape_cast %24 : vector<4xf32> to vector<4x1xf32>
    %26 = vector.broadcast %25 : vector<4x1xf32> to vector<4x4xf32>
    %27 = arith.subf %23, %26 : vector<4x4xf32>
    %28 = math.exp %27 : vector<4x4xf32>
    %cst_23 = arith.constant dense<0.000000e+00> : vector<4xf32>
    %29 = vector.multi_reduction <add>, %28, %cst_23 [1] : vector<4x4xf32> to vector<4xf32>
    %30 = vector.shape_cast %29 : vector<4xf32> to vector<4x1xf32>
    %31 = tpu.reciprocal %30 {approx = true} : vector<4x1xf32> -> vector<4x1xf32>
    %32 = vector.broadcast %31 : vector<4x1xf32> to vector<4x4xf32>
    %33 = arith.mulf %28, %32 : vector<4x4xf32>
    %cst_24 = arith.constant dense<0.000000e+00> : vector<4x128xf32>
    %34 = tpu.matmul %33, %20, %cst_24 {dimension_numbers = #tpu.dot_dimension_numbers<[1], [0], [0], [1], [0, 0, 1, 1], [], []>} : vector<4x4xf32>, vector<4x128xf32>, vector<4x128xf32> -> vector<4x128xf32>
    %c0_25 = arith.constant 0 : index
    %c0_26 = arith.constant 0 : index
    %35 = vector.load %arg9[%c0_25, %c0_26] : memref<128x128xf32, #tpu.memory_space<vmem>>, vector<128x128xf32>
    %cst_27 = arith.constant dense<0.000000e+00> : vector<4x128xf32>
    %36 = tpu.matmul %34, %35, %cst_27 {dimension_numbers = #tpu.dot_dimension_numbers<[1], [0], [0], [1], [0, 0, 1, 1], [], []>} : vector<4x128xf32>, vector<128x128xf32>, vector<4x128xf32> -> vector<4x128xf32>
    %c0_28 = arith.constant 0 : index
    %c0_29 = arith.constant 0 : index
    %37 = vector.load %arg10[%c0_28, %c0_29] : memref<1x128xf32, #tpu.memory_space<vmem>>, vector<1x128xf32>
    %38 = vector.broadcast %37 : vector<1x128xf32> to vector<4x128xf32>
    %39 = arith.addf %36, %38 : vector<4x128xf32>
    %40 = arith.addf %5, %39 : vector<4x128xf32>
    %cst_30 = arith.constant dense<0.000000e+00> : vector<4xf32>
    %41 = vector.multi_reduction <add>, %40, %cst_30 [1] : vector<4x128xf32> to vector<4xf32>
    %42 = vector.shape_cast %41 : vector<4xf32> to vector<4x1xf32>
    %43 = arith.mulf %40, %40 : vector<4x128xf32>
    %cst_31 = arith.constant dense<0.000000e+00> : vector<4xf32>
    %44 = vector.multi_reduction <add>, %43, %cst_31 [1] : vector<4x128xf32> to vector<4xf32>
    %45 = vector.shape_cast %44 : vector<4xf32> to vector<4x1xf32>
    %cst_32 = arith.constant 1.000000e+02 : f32
    %46 = vector.broadcast %cst_32 : f32 to vector<4x1xf32>
    %47 = arith.divf %42, %46 : vector<4x1xf32>
    %cst_33 = arith.constant 1.000000e+02 : f32
    %48 = vector.broadcast %cst_33 : f32 to vector<4x1xf32>
    %49 = arith.divf %45, %48 : vector<4x1xf32>
    %50 = arith.mulf %47, %47 : vector<4x1xf32>
    %51 = arith.subf %49, %50 : vector<4x1xf32>
    %52 = vector.broadcast %47 : vector<4x1xf32> to vector<4x128xf32>
    %53 = arith.subf %40, %52 : vector<4x128xf32>
    %cst_34 = arith.constant 9.99999974E-6 : f32
    %54 = vector.broadcast %cst_34 : f32 to vector<4x1xf32>
    %55 = arith.addf %51, %54 : vector<4x1xf32>
    %56 = math.rsqrt %55 : vector<4x1xf32>
    %57 = vector.broadcast %56 : vector<4x1xf32> to vector<4x128xf32>
    %58 = arith.mulf %53, %57 : vector<4x128xf32>
    %c0_35 = arith.constant 0 : index
    %c0_36 = arith.constant 0 : index
    %59 = vector.load %arg11[%c0_35, %c0_36] : memref<1x128xf32, #tpu.memory_space<vmem>>, vector<1x128xf32>
    %60 = vector.broadcast %59 : vector<1x128xf32> to vector<4x128xf32>
    %61 = arith.mulf %58, %60 : vector<4x128xf32>
    %c0_37 = arith.constant 0 : index
    %c0_38 = arith.constant 0 : index
    %62 = vector.load %arg12[%c0_37, %c0_38] : memref<1x128xf32, #tpu.memory_space<vmem>>, vector<1x128xf32>
    %63 = vector.broadcast %62 : vector<1x128xf32> to vector<4x128xf32>
    %64 = arith.addf %61, %63 : vector<4x128xf32>
    %c0_39 = arith.constant 0 : index
    %c0_40 = arith.constant 0 : index
    %65 = vector.load %arg13[%c0_39, %c0_40] : memref<128x128xf32, #tpu.memory_space<vmem>>, vector<128x128xf32>
    %cst_41 = arith.constant dense<0.000000e+00> : vector<4x128xf32>
    %66 = tpu.matmul %64, %65, %cst_41 {dimension_numbers = #tpu.dot_dimension_numbers<[1], [0], [0], [1], [0, 0, 1, 1], [], []>} : vector<4x128xf32>, vector<128x128xf32>, vector<4x128xf32> -> vector<4x128xf32>
    %c0_42 = arith.constant 0 : index
    %c0_43 = arith.constant 0 : index
    %67 = vector.load %arg14[%c0_42, %c0_43] : memref<1x128xf32, #tpu.memory_space<vmem>>, vector<1x128xf32>
    %68 = vector.broadcast %67 : vector<1x128xf32> to vector<4x128xf32>
    %69 = arith.addf %66, %68 : vector<4x128xf32>
    %cst_44 = arith.constant 0.000000e+00 : f32
    %70 = vector.broadcast %cst_44 : f32 to vector<4x128xf32>
    %71 = arith.maximumf %69, %70 : vector<4x128xf32>
    %c0_45 = arith.constant 0 : index
    %c0_46 = arith.constant 0 : index
    %72 = vector.load %arg15[%c0_45, %c0_46] : memref<128x128xf32, #tpu.memory_space<vmem>>, vector<128x128xf32>
    %cst_47 = arith.constant dense<0.000000e+00> : vector<4x128xf32>
    %73 = tpu.matmul %71, %72, %cst_47 {dimension_numbers = #tpu.dot_dimension_numbers<[1], [0], [0], [1], [0, 0, 1, 1], [], []>} : vector<4x128xf32>, vector<128x128xf32>, vector<4x128xf32> -> vector<4x128xf32>
    %c0_48 = arith.constant 0 : index
    %c0_49 = arith.constant 0 : index
    %74 = vector.load %arg16[%c0_48, %c0_49] : memref<1x128xf32, #tpu.memory_space<vmem>>, vector<1x128xf32>
    %75 = vector.broadcast %74 : vector<1x128xf32> to vector<4x128xf32>
    %76 = arith.addf %73, %75 : vector<4x128xf32>
    %77 = arith.addf %64, %76 : vector<4x128xf32>
    %cst_50 = arith.constant dense<0.000000e+00> : vector<4xf32>
    %78 = vector.multi_reduction <add>, %77, %cst_50 [1] : vector<4x128xf32> to vector<4xf32>
    %79 = vector.shape_cast %78 : vector<4xf32> to vector<4x1xf32>
    %80 = arith.mulf %77, %77 : vector<4x128xf32>
    %cst_51 = arith.constant dense<0.000000e+00> : vector<4xf32>
    %81 = vector.multi_reduction <add>, %80, %cst_51 [1] : vector<4x128xf32> to vector<4xf32>
    %82 = vector.shape_cast %81 : vector<4xf32> to vector<4x1xf32>
    %cst_52 = arith.constant 1.000000e+02 : f32
    %83 = vector.broadcast %cst_52 : f32 to vector<4x1xf32>
    %84 = arith.divf %79, %83 : vector<4x1xf32>
    %cst_53 = arith.constant 1.000000e+02 : f32
    %85 = vector.broadcast %cst_53 : f32 to vector<4x1xf32>
    %86 = arith.divf %82, %85 : vector<4x1xf32>
    %87 = arith.mulf %84, %84 : vector<4x1xf32>
    %88 = arith.subf %86, %87 : vector<4x1xf32>
    %89 = vector.broadcast %84 : vector<4x1xf32> to vector<4x128xf32>
    %90 = arith.subf %77, %89 : vector<4x128xf32>
    %cst_54 = arith.constant 9.99999974E-6 : f32
    %91 = vector.broadcast %cst_54 : f32 to vector<4x1xf32>
    %92 = arith.addf %88, %91 : vector<4x1xf32>
    %93 = math.rsqrt %92 : vector<4x1xf32>
    %94 = vector.broadcast %93 : vector<4x1xf32> to vector<4x128xf32>
    %95 = arith.mulf %90, %94 : vector<4x128xf32>
    %c0_55 = arith.constant 0 : index
    %c0_56 = arith.constant 0 : index
    %96 = vector.load %arg17[%c0_55, %c0_56] : memref<1x128xf32, #tpu.memory_space<vmem>>, vector<1x128xf32>
    %97 = vector.broadcast %96 : vector<1x128xf32> to vector<4x128xf32>
    %98 = arith.mulf %95, %97 : vector<4x128xf32>
    %c0_57 = arith.constant 0 : index
    %c0_58 = arith.constant 0 : index
    %99 = vector.load %arg18[%c0_57, %c0_58] : memref<1x128xf32, #tpu.memory_space<vmem>>, vector<1x128xf32>
    %100 = vector.broadcast %99 : vector<1x128xf32> to vector<4x128xf32>
    %101 = arith.addf %98, %100 : vector<4x128xf32>
    %c0_59 = arith.constant 0 : index
    %c0_60 = arith.constant 0 : index
    %102 = vector.load %arg19[%c0_59, %c0_60] : memref<128x128xf32, #tpu.memory_space<vmem>>, vector<128x128xf32>
    %cst_61 = arith.constant dense<0.000000e+00> : vector<4x128xf32>
    %103 = tpu.matmul %101, %102, %cst_61 {dimension_numbers = #tpu.dot_dimension_numbers<[1], [0], [0], [1], [0, 0, 1, 1], [], []>} : vector<4x128xf32>, vector<128x128xf32>, vector<4x128xf32> -> vector<4x128xf32>
    %c0_62 = arith.constant 0 : index
    %c0_63 = arith.constant 0 : index
    %104 = vector.load %arg20[%c0_62, %c0_63] : memref<1x128xf32, #tpu.memory_space<vmem>>, vector<1x128xf32>
    %105 = vector.broadcast %104 : vector<1x128xf32> to vector<4x128xf32>
    %106 = arith.addf %103, %105 : vector<4x128xf32>
    %c0_64 = arith.constant 0 : index
    %c0_65 = arith.constant 0 : index
    %107 = vector.load %arg21[%c0_64, %c0_65] : memref<4x128xf32, #tpu.memory_space<vmem>>, vector<4x128xf32>
    tpu.vector_store %arg21[%c0_64, %c0_65], %106 {strides = array<i32>} : memref<4x128xf32, #tpu.memory_space<vmem>>, vector<4x128xf32>,
    return
  }
}

module attributes {stable_mosaic.version = 11 : i64} {
  func.func @_fin_kernel(%arg0: memref<4x128xf32, #tpu.memory_space<vmem>>, %arg1: memref<4x128xf32, #tpu.memory_space<vmem>>, %arg2: memref<128x128xf32, #tpu.memory_space<vmem>>, %arg3: memref<128x128xf32, #tpu.memory_space<vmem>>, %arg4: memref<1x128xf32, #tpu.memory_space<vmem>>, %arg5: memref<4x128xf32, #tpu.memory_space<vmem>>) attributes {dimension_semantics = [], scalar_prefetch = 0 : i64, scratch_operands = 0 : i64, tpu.core_type = #tpu.core_type<tc>} {
    %c0 = arith.constant 0 : index
    %c0_0 = arith.constant 0 : index
    %0 = vector.load %arg0[%c0, %c0_0] : memref<4x128xf32, #tpu.memory_space<vmem>>, vector<4x128xf32>
    %c0_1 = arith.constant 0 : index
    %c0_2 = arith.constant 0 : index
    %1 = vector.load %arg2[%c0_1, %c0_2] : memref<128x128xf32, #tpu.memory_space<vmem>>, vector<128x128xf32>
    %cst = arith.constant dense<0.000000e+00> : vector<4x128xf32>
    %2 = tpu.matmul %0, %1, %cst {dimension_numbers = #tpu.dot_dimension_numbers<[1], [0], [0], [1], [0, 0, 1, 1], [], []>} : vector<4x128xf32>, vector<128x128xf32>, vector<4x128xf32> -> vector<4x128xf32>
    %c0_3 = arith.constant 0 : index
    %c0_4 = arith.constant 0 : index
    %3 = vector.load %arg1[%c0_3, %c0_4] : memref<4x128xf32, #tpu.memory_space<vmem>>, vector<4x128xf32>
    %c0_5 = arith.constant 0 : index
    %c0_6 = arith.constant 0 : index
    %4 = vector.load %arg3[%c0_5, %c0_6] : memref<128x128xf32, #tpu.memory_space<vmem>>, vector<128x128xf32>
    %cst_7 = arith.constant dense<0.000000e+00> : vector<4x128xf32>
    %5 = tpu.matmul %3, %4, %cst_7 {dimension_numbers = #tpu.dot_dimension_numbers<[1], [0], [0], [1], [0, 0, 1, 1], [], []>} : vector<4x128xf32>, vector<128x128xf32>, vector<4x128xf32> -> vector<4x128xf32>
    %6 = arith.addf %2, %5 : vector<4x128xf32>
    %c0_8 = arith.constant 0 : index
    %c0_9 = arith.constant 0 : index
    %7 = vector.load %arg4[%c0_8, %c0_9] : memref<1x128xf32, #tpu.memory_space<vmem>>, vector<1x128xf32>
    %8 = vector.broadcast %7 : vector<1x128xf32> to vector<4x128xf32>
    %9 = arith.addf %6, %8 : vector<4x128xf32>
    %c0_10 = arith.constant 0 : index
    %c0_11 = arith.constant 0 : index
    %10 = vector.load %arg5[%c0_10, %c0_11] : memref<4x128xf32, #tpu.memory_space<vmem>>, vector<4x128xf32>
    tpu.vector_store %arg5[%c0_10, %c0_11], %9 {strides = array<i32>} : memref<4x128xf32, #tpu.memory_space<vmem>>, vector<4x128xf32>,
    return
  }
}

</mosaic_0001>

<bundles_post_ra>
// kernel: classifier_forward.5
= control target key start
LH: loop header
LB: loop body
LE: loop exit
PB: predicated region body
PF: predicated region fallthrough
CT: control target
= control target key end

     0   :  { %v399_v3 = vmov 0.0|0.0   ;;  %vm400_vm0 = vmmov 0   ;;  %v401_v11 = vmov 0.0   ;;  %s566_s0 = inlined_call_operand.vmem [shape: f32[4,128], index: 0, kind: input, shape index: {}]   ;;  %s567_s1 = inlined_call_operand.vmem [shape: f32[4,128], index: 1, kind: input, shape index: {}]   ;;  %s568_s2 = inlined_call_operand.vmem [shape: f32[128,128], index: 2, kind: input, shape index: {}]   ;;  %s569_s3 = inlined_call_operand.vmem [shape: f32[128,128], index: 3, kind: input, shape index: {}]   ;;  %s570_s4 = inlined_call_operand.vmem [shape: f32[1,128], index: 4, kind: input, shape index: {}]   ;;  %s571_s5 = inlined_call_operand.hbm [shape: f32[4,128], index: 5, kind: output, shape index: {}]  }
   0x1   :  { %v39_v0 = vld [vmem:[%s569_s3] sm:$0xff]  ;;  %v40_v1 = vld [vmem:[%s569_s3 + $0x8] sm:$0xff]  ;;  %323 = vmatprep.subr.bf16.mxu0 %v399_v3  ;;  %347 = vmatprep.subr.bf16.mxu1 %v399_v3  ;;  %v41_v6 = vld [vmem:[%s569_s3 + $0x10] sm:$0xff] }
   0x2   :  { %v22_v2 = vld [vmem:[%s568_s2] sm:$0xff]  ;;  %v324_v4 = vpack.c.bf16 %v40_v1, %v39_v0  ;;  %v23_v5 = vld [vmem:[%s568_s2 + $0x8] sm:$0xff]  ;;  %v42_v7 = vld [vmem:[%s569_s3 + $0x18] sm:$0xff]  ;;  %285 = vmatprep.mubr.msk.f32.mxu0 %vm400_vm0, %v401_v11  ;;  %320 = vmatprep.mubr.msk.f32.mxu1 %vm400_vm0, %v401_v11 }
   0x3   :  { %v348_v8 = vpack.c.bf16 %v23_v5, %v22_v2  ;;  %v24_v9 = vld [vmem:[%s568_s2 + $0x10] sm:$0xff]  ;;  %v25_v10 = vld [vmem:[%s568_s2 + $0x18] sm:$0xff]  ;;  %v327_v12 = vpack.c.bf16 %v42_v7, %v41_v6  ;;  %v43_v14 = vld [vmem:[%s569_s3 + $0x20] sm:$0xff] }
   0x4   :  { %325 = vmatpush3.bf16.msra.mxu0 %v324_v4  ;;  %v351_v13 = vpack.c.bf16 %v25_v10, %v24_v9  ;;  %v44_v15 = vld [vmem:[%s569_s3 + $0x28] sm:$0xff]  ;;  %v26_v16 = vld [vmem:[%s568_s2 + $0x20] sm:$0xff]  ;;  %v45_v20 = vld [vmem:[%s569_s3 + $0x30] sm:$0xff] }
   0x5   :  { %349 = vmatpush3.bf16.msra.mxu1 %v348_v8  ;;  %326 = vmatprep.subr.bf16.mxu0 %v399_v3  ;;  %v27_v17 = vld [vmem:[%s568_s2 + $0x28] sm:$0xff]  ;;  %v330_v18 = vpack.c.bf16 %v44_v15, %v43_v14  ;;  %v46_v21 = vld [vmem:[%s569_s3 + $0x38] sm:$0xff]  ;;  %v28_v22 = vld [vmem:[%s568_s2 + $0x30] sm:$0xff] }
   0x6   :  { %350 = vmatprep.subr.bf16.mxu1 %v399_v3  ;;  %v354_v19 = vpack.c.bf16 %v27_v17, %v26_v16  ;;  %v29_v23 = vld [vmem:[%s568_s2 + $0x38] sm:$0xff]  ;;  %v333_v24 = vpack.c.bf16 %v46_v21, %v45_v20 }
   0x8   :  { %328 = vmatpush3.bf16.msra.mxu0 %v327_v12 }
   0x9   :  { %352 = vmatpush3.bf16.msra.mxu1 %v351_v13  ;;  %329 = vmatprep.subr.bf16.mxu0 %v399_v3 }
   0xa   :  { %353 = vmatprep.subr.bf16.mxu1 %v399_v3 }
   0xc   :  { %331 = vmatpush3.bf16.msra.mxu0 %v330_v18 }
   0xd   :  { %10 = vsyncpa [#allocation3], 0  ;;  %355 = vmatpush3.bf16.msra.mxu1 %v354_v19  ;;  %332 = vmatprep.subr.bf16.mxu0 %v399_v3  ;;  %v357_v25 = vpack.c.bf16 %v29_v23, %v28_v22  ;;  %v47_v26 = vld [vmem:[%s569_s3 + $0x40] sm:$0xff]  ;;  %v48_v27 = vld [vmem:[%s569_s3 + $0x48] sm:$0xff]  ;;  %s402_s11 = smov [#allocation2]  }
   0xe   :  { %356 = vmatprep.subr.bf16.mxu1 %v399_v3  ;;  %v30_v28 = vld [vmem:[%s568_s2 + $0x40] sm:$0xff]  ;;  %v31_v29 = vld [vmem:[%s568_s2 + $0x48] sm:$0xff]  ;;  %v336_v30 = vpack.c.bf16 %v48_v27, %v47_v26  ;;  %v49_v32 = vld [vmem:[%s569_s3 + $0x50] sm:$0xff]  ;;  %s210_s12 = sshll.u32 %s402_s11, 4  ;;  %s211_s12 = int_to_ptr.vmem [resolvable:$true] %s210_s12 }
   0xf   :  { %v360_v31 = vpack.c.bf16 %v31_v29, %v30_v28  ;;  %v50_v33 = vld [vmem:[%s569_s3 + $0x58] sm:$0xff]  ;;  %v32_v34 = vld [vmem:[%s568_s2 + $0x50] sm:$0xff]  ;;  %v51_v38 = vld [vmem:[%s569_s3 + $0x60] sm:$0xff]  ;;  %p380_p1 = scmp.lt.s32.totalorder %s211_s12, %s211_s12 }
  0x10   :  { %334 = vmatpush3.bf16.msra.mxu0 %v333_v24  ;;  %v33_v35 = vld [vmem:[%s568_s2 + $0x58] sm:$0xff]  ;;  %v339_v36 = vpack.c.bf16 %v50_v33, %v49_v32  ;;  %v52_v39 = vld [vmem:[%s569_s3 + $0x68] sm:$0xff]  ;;  %v34_v40 = vld [vmem:[%s568_s2 + $0x60] sm:$0xff] }
  0x11   :  { %358 = vmatpush3.bf16.msra.mxu1 %v357_v25  ;;  %335 = vmatprep.subr.bf16.mxu0 %v399_v3  ;;  %v363_v37 = vpack.c.bf16 %v33_v35, %v32_v34  ;;  %v35_v41 = vld [vmem:[%s568_s2 + $0x68] sm:$0xff]  ;;  %v342_v42 = vpack.c.bf16 %v52_v39, %v51_v38  ;;  %v53_v44 = vld [vmem:[%s569_s3 + $0x70] sm:$0xff]  ;;  %v54_v45 = vld [vmem:[%s569_s3 + $0x78] sm:$0xff] }
  0x12   :  { %359 = vmatprep.subr.bf16.mxu1 %v399_v3  ;;  %v366_v43 = vpack.c.bf16 %v35_v41, %v34_v40  ;;  %v36_v46 = vld [vmem:[%s568_s2 + $0x70] sm:$0xff]  ;;  %v37_v47 = vld [vmem:[%s568_s2 + $0x78] sm:$0xff]  ;;  %v345_v48 = vpack.c.bf16 %v54_v45, %v53_v44  ;;  %v38_v50 = vld [vmem:[%s567_s1] sm:$0xf]  ;;  %s375_s1 = scalar_lea.vmem %s211_s12, 64 }
  0x13   :  { %v369_v49 = vpack.c.bf16 %v37_v47, %v36_v46  ;;  %v21_v51 = vld [vmem:[%s566_s0] sm:$0xf]  ;;  %p376_p0 = scmp.ne.s32.totalorder %s211_s12, %s375_s1  ;;  %p381_p2 = scmp.lt.s32.totalorder %s375_s1, %s375_s1 }
  0x14   :  { %337 = vmatpush3.bf16.msra.mxu0 %v336_v30  ;;  %v218_v55 = vld [vmem:[%s570_s4] ss:$0 sm:$0xff] }
  0x15   :  { %361 = vmatpush3.bf16.msra.mxu1 %v360_v31  ;;  %338 = vmatprep.subr.bf16.mxu0 %v399_v3  ;;  %p382_p3 = por %p381_p2, %p380_p1 }
  0x16   :  { %362 = vmatprep.subr.bf16.mxu1 %v399_v3 }
  0x17   :  { %p383_p4 = pnand %p382_p3, %p376_p0 }
  0x18   :  { %340 = vmatpush3.bf16.msra.mxu0 %v339_v36 }
  0x19   :  { %364 = vmatpush3.bf16.msra.mxu1 %v363_v37  ;;  %341 = vmatprep.subr.bf16.mxu0 %v399_v3 }
  0x1a   :  { %365 = vmatprep.subr.bf16.mxu1 %v399_v3 }
  0x1c   :  { %343 = vmatpush3.bf16.msra.mxu0 %v342_v42 }
  0x1d   :  { %367 = vmatpush3.bf16.msra.mxu1 %v366_v43  ;;  %344 = vmatprep.subr.bf16.mxu0 %v399_v3 }
  0x1e   :  { %368 = vmatprep.subr.bf16.mxu1 %v399_v3 }
  0x20   :  { %346 = vmatpush3.bf16.msra.mxu0 %v345_v48 }
  0x21   :  { %370 = vmatpush3.bf16.msra.mxu1 %v369_v49 }
  0x23   :  { %286 = vmatmul.mubr.f32.vlgmr.msra.gmra.mrb[0].mxu0 %v38_v50 }
  0x24   :  { %321 = vmatmul.mubr.f32.vlgmr.msra.gmra.mrb[0].mxu1 %v21_v51 }
  0xf6   :  { %v121_v52 = vpop.f32.mrb[0].mxu0 }
  0xf7   :  { %v191_v53 = vpop.f32.mrb[0].mxu1  ;;  %v287_v54 = vpop.f32.mrb[1].mxu0 }
  0xf8   :  { %v192_v56 = vadd.f32 %v191_v53, %v121_v52  ;;  %v322_v57 = vpop.f32.mrb[1].mxu1 }
  0xfa   :  { %v202_v58 = vadd.f32 %v218_v55, %v192_v56 }
  0xfc   :  { %203 = vst [vmem:[#allocation2] sm:$0xf] %v202_v58 }
  0xfd   :  { %386 = shalt.err (!%p383_p4)
}
  0xfe   :  { %s387_s14 = scalar_lea.hbm %s571_s5, 64 }
  0xff   :  { %p388_p5 = scmp.ne.s32.totalorder %s571_s5, %s387_s14  ;;  %p391_p6 = scmp.lt.u32.totalorder %s387_s14, %s571_s5 }
 0x101   :  { %p393_p7 = pnand %p391_p6, %p388_p5 }
 0x103   :  { %396 = shalt.err (!%p393_p7)
}
 0x104   :  { %213 = dma.vmem_to_hbm [thread:$0]  %s211_s12, 64, %s571_s5, [#allocation3]  }
 0x105   :  { %397 = dma.done.wait [#allocation3], 64  }
 0x106   :  { %398 = vsyncadd [#allocation3], 4294967232 }
 0x107   :  { %217 = vsyncpa [#allocation3], 1 }

// kernel: classifier_forward.4
= control target key start
LH: loop header
LB: loop body
LE: loop exit
PB: predicated region body
PF: predicated region fallthrough
CT: control target
= control target key end

     0   :  { %v1692_v0 = vmov 0.0|0.0   ;;  %vm1693_vm0 = vmmov 0   ;;  %v1694_v4 = vmov 0.0   ;;  %vm528_vm1 = vcmask 1043456   ;;  %s2334_s1 = inlined_call_operand.vmem [shape: f32[128,128], index: 1, kind: input, shape index: {}]   ;;  %s2335_s3 = inlined_call_operand.vmem [shape: f32[128,128], index: 3, kind: input, shape index: {}]   ;;  %s2336_s5 = inlined_call_operand.vmem [shape: f32[128,128], index: 5, kind: input, shape index: {}]   ;;  %s2337_s0 = inlined_call_operand.vmem [shape: f32[4,128], index: 0, kind: input, shape index: {}]   ;;  %s2338_s7 = inlined_call_operand.vmem [shape: f32[128,128], index: 7, kind: input, shape index: {}]   ;;  %s2339_s2 = inlined_call_operand.vmem [shape: f32[1,128], index: 2, kind: input, shape index: {}]   ;;  %s2340_s6 = inlined_call_operand.vmem [shape: f32[1,128], index: 6, kind: input, shape index: {}]   ;;  %s2341_s4 = inlined_call_operand.vmem [shape: f32[1,128], index: 4, kind: input, shape index: {}]   ;;  %s2342_s8 = inlined_call_operand.vmem [shape: f32[1,128], index: 8, kind: input, shape index: {}]   ;;  %s2343_s9 = inlined_call_operand.vmem [shape: f32[128,128], index: 9, kind: input, shape index: {}]   ;;  %s2344_s13 = inlined_call_operand.vmem [shape: f32[128,128], index: 13, kind: input, shape index: {}]   ;;  %s2345_s10 = inlined_call_operand.vmem [shape: f32[1,128], index: 10, kind: input, shape index: {}]   ;;  %s2346_s15 = inlined_call_operand.vmem [shape: f32[128,128], index: 15, kind: input, shape index: {}]   ;;  %s2347_s11 = inlined_call_operand.vmem [shape: f32[1,128], index: 11, kind: input, shape index: {}]   ;;  %s2348_s12 = inlined_call_operand.vmem [shape: f32[1,128], index: 12, kind: input, shape index: {}]   ;;  %s2349_s14 = inlined_call_operand.vmem [shape: f32[1,128], index: 14, kind: input, shape index: {}]   ;;  %s2350_s19 = inlined_call_operand.vmem [shape: f32[128,128], index: 19, kind: input, shape index: {}]   ;;  %s2351_s16 = inlined_call_operand.vmem [shape: f32[1,128], index: 16, kind: input, shape index: {}]   ;;  %s2352_s17 = inlined_call_operand.vmem [shape: f32[1,128], index: 17, kind: input, shape index: {}]   ;;  %s2353_s18 = inlined_call_operand.vmem [shape: f32[1,128], index: 18, kind: input, shape index: {}]   ;;  %s2354_s20 = inlined_call_operand.vmem [shape: f32[1,128], index: 20, kind: input, shape index: {}]   ;;  %s2355_s21 = inlined_call_operand.vmem [shape: f32[4,128], index: 21, kind: output, shape index: {}]  }
   0x1   :  { %2360 = sst [smem:[#allocation2_spill]] %s2334_s1  ;;  %1489 = vmatprep.subr.bf16.mxu0 %v1692_v0  ;;  %1231 = vmatprep.mubr.msk.f32.mxu0 %vm1693_vm0, %v1694_v4  ;;  %vm512_vm2 = vcmask 27648   ;;  %vm524_vm3 = vcmask 31744  }
   0x2   :  { %2361 = sst [smem:[#allocation3_spill]] %s2335_s3  ;;  %s2366_s26 = sld [smem:[#allocation2_spill]]  ;;  %1513 = vmatprep.subr.bf16.mxu1 %v1692_v0  ;;  %1266 = vmatprep.mubr.msk.f32.mxu1 %vm1693_vm0, %v1694_v4 }
   0x3   :  { %2362 = sst [smem:[#allocation4_spill]] %s2336_s5  ;;  %s2367_s5 = sld [smem:[#allocation3_spill]] }
   0x4   :  { %2363 = sst [smem:[#allocation5_spill]] %s2337_s0  ;;  %s2368_s22 = sld [smem:[#allocation4_spill]] }
   0x5   :  { %2364 = sst [smem:[#allocation6_spill]] %s2338_s7  ;;  %s2369_s29 = sld [smem:[#allocation5_spill]] }
   0x6   :  { %2365 = sst [smem:[#allocation7_spill]] %s2339_s2  ;;  %s2370_s30 = sld [smem:[#allocation6_spill]] }
   0x7   :  { %s2371_s3 = sld [smem:[#allocation7_spill]] }
   0x8   :  { %v69_v1 = vld [vmem:[%s2366_s26] sm:$0xff]  ;;  %v70_v2 = vld [vmem:[%s2366_s26 + $0x8] sm:$0xff]  ;;  %v71_v3 = vld [vmem:[%s2366_s26 + $0x10] sm:$0xff] }
   0x9   :  { %v1490_v5 = vpack.c.bf16 %v70_v2, %v69_v1  ;;  %v72_v6 = vld [vmem:[%s2366_s26 + $0x18] sm:$0xff]  ;;  %v73_v8 = vld [vmem:[%s2366_s26 + $0x20] sm:$0xff]  ;;  %v74_v9 = vld [vmem:[%s2366_s26 + $0x28] sm:$0xff] }
   0xa   :  { %v1493_v7 = vpack.c.bf16 %v72_v6, %v71_v3  ;;  %v162_v10 = vld [vmem:[%s2367_s5] sm:$0xff]  ;;  %v163_v11 = vld [vmem:[%s2367_s5 + $0x8] sm:$0xff]  ;;  %v1496_v12 = vpack.c.bf16 %v74_v9, %v73_v8  ;;  %v164_v14 = vld [vmem:[%s2367_s5 + $0x10] sm:$0xff] }
   0xb   :  { %1491 = vmatpush3.bf16.msra.mxu0 %v1490_v5  ;;  %v1514_v13 = vpack.c.bf16 %v163_v11, %v162_v10  ;;  %v165_v15 = vld [vmem:[%s2367_s5 + $0x18] sm:$0xff]  ;;  %v75_v16 = vld [vmem:[%s2366_s26 + $0x30] sm:$0xff]  ;;  %v166_v19 = vld [vmem:[%s2367_s5 + $0x20] sm:$0xff] }
   0xc   :  { %1492 = vmatprep.subr.bf16.mxu0 %v1692_v0  ;;  %v76_v17 = vld [vmem:[%s2366_s26 + $0x38] sm:$0xff]  ;;  %v1517_v18 = vpack.c.bf16 %v165_v15, %v164_v14  ;;  %v167_v20 = vld [vmem:[%s2367_s5 + $0x28] sm:$0xff]  ;;  %v77_v22 = vld [vmem:[%s2366_s26 + $0x40] sm:$0xff] }
   0xd   :  { %1515 = vmatpush3.bf16.msra.mxu1 %v1514_v13  ;;  %v1499_v21 = vpack.c.bf16 %v76_v17, %v75_v16  ;;  %v78_v23 = vld [vmem:[%s2366_s26 + $0x48] sm:$0xff]  ;;  %v1520_v24 = vpack.c.bf16 %v167_v20, %v166_v19  ;;  %v168_v25 = vld [vmem:[%s2367_s5 + $0x30] sm:$0xff]  ;;  %v169_v26 = vld [vmem:[%s2367_s5 + $0x38] sm:$0xff] }
   0xe   :  { %1516 = vmatprep.subr.bf16.mxu1 %v1692_v0  ;;  %v1502_v27 = vpack.c.bf16 %v78_v23, %v77_v22  ;;  %v79_v28 = vld [vmem:[%s2366_s26 + $0x50] sm:$0xff]  ;;  %v80_v29 = vld [vmem:[%s2366_s26 + $0x58] sm:$0xff]  ;;  %v1523_v30 = vpack.c.bf16 %v169_v26, %v168_v25  ;;  %v170_v31 = vld [vmem:[%s2367_s5 + $0x40] sm:$0xff] }
   0xf   :  { %1494 = vmatpush3.bf16.msra.mxu0 %v1493_v7  ;;  %v171_v32 = vld [vmem:[%s2367_s5 + $0x48] sm:$0xff]  ;;  %v1505_v33 = vpack.c.bf16 %v80_v29, %v79_v28  ;;  %v81_v34 = vld [vmem:[%s2366_s26 + $0x60] sm:$0xff]  ;;  %v172_v37 = vld [vmem:[%s2367_s5 + $0x50] sm:$0xff] }
  0x10   :  { %1495 = vmatprep.subr.bf16.mxu0 %v1692_v0  ;;  %v82_v35 = vld [vmem:[%s2366_s26 + $0x68] sm:$0xff]  ;;  %v1526_v36 = vpack.c.bf16 %v171_v32, %v170_v31  ;;  %v173_v38 = vld [vmem:[%s2367_s5 + $0x58] sm:$0xff]  ;;  %v83_v40 = vld [vmem:[%s2366_s26 + $0x70] sm:$0xff] }
  0x11   :  { %1518 = vmatpush3.bf16.msra.mxu1 %v1517_v18  ;;  %v1508_v39 = vpack.c.bf16 %v82_v35, %v81_v34  ;;  %v84_v41 = vld [vmem:[%s2366_s26 + $0x78] sm:$0xff]  ;;  %v1529_v42 = vpack.c.bf16 %v173_v38, %v172_v37  ;;  %v174_v43 = vld [vmem:[%s2367_s5 + $0x60] sm:$0xff]  ;;  %v175_v44 = vld [vmem:[%s2367_s5 + $0x68] sm:$0xff] }
  0x12   :  { %1519 = vmatprep.subr.bf16.mxu1 %v1692_v0  ;;  %v1511_v45 = vpack.c.bf16 %v84_v41, %v83_v40  ;;  %v255_v46 = vld [vmem:[%s2368_s22] sm:$0xff]  ;;  %v256_v47 = vld [vmem:[%s2368_s22 + $0x8] sm:$0xff]  ;;  %v1532_v48 = vpack.c.bf16 %v175_v44, %v174_v43  ;;  %v176_v49 = vld [vmem:[%s2367_s5 + $0x70] sm:$0xff] }
  0x13   :  { %1497 = vmatpush3.bf16.msra.mxu0 %v1496_v12  ;;  %v177_v50 = vld [vmem:[%s2367_s5 + $0x78] sm:$0xff]  ;;  %v68_v51 = vld [vmem:[%s2369_s29] sm:$0xf]  ;;  %v1538_v52 = vpack.c.bf16 %v256_v47, %v255_v46  ;;  %v257_v53 = vld [vmem:[%s2368_s22 + $0x10] sm:$0xff] }
  0x14   :  { %1498 = vmatprep.subr.bf16.mxu0 %v1692_v0  ;;  %v258_v54 = vld [vmem:[%s2368_s22 + $0x18] sm:$0xff]  ;;  %v1535_v55 = vpack.c.bf16 %v177_v50, %v176_v49  ;;  %v259_v57 = vld [vmem:[%s2368_s22 + $0x20] sm:$0xff]  ;;  %v260_v58 = vld [vmem:[%s2368_s22 + $0x28] sm:$0xff] }
  0x15   :  { %1521 = vmatpush3.bf16.msra.mxu1 %v1520_v24  ;;  %v1541_v56 = vpack.c.bf16 %v258_v54, %v257_v53  ;;  %v1544_v59 = vpack.c.bf16 %v260_v58, %v259_v57  ;;  %v261_v60 = vld [vmem:[%s2368_s22 + $0x30] sm:$0xff]  ;;  %v262_v61 = vld [vmem:[%s2368_s22 + $0x38] sm:$0xff]  ;;  %v263_v63 = vld [vmem:[%s2368_s22 + $0x40] sm:$0xff] }
  0x16   :  { %1522 = vmatprep.subr.bf16.mxu1 %v1692_v0  ;;  %v1547_v62 = vpack.c.bf16 %v262_v61, %v261_v60  ;;  %v264_v1 = vld [vmem:[%s2368_s22 + $0x48] sm:$0xff]  ;;  %v265_v3 = vld [vmem:[%s2368_s22 + $0x50] sm:$0xff]  ;;  %v266_v5 = vld [vmem:[%s2368_s22 + $0x58] sm:$0xff] }
  0x17   :  { %1500 = vmatpush3.bf16.msra.mxu0 %v1499_v21  ;;  %v1550_v2 = vpack.c.bf16 %v264_v1, %v263_v63  ;;  %v1553_v6 = vpack.c.bf16 %v266_v5, %v265_v3  ;;  %v267_v7 = vld [vmem:[%s2368_s22 + $0x60] sm:$0xff]  ;;  %v268_v8 = vld [vmem:[%s2368_s22 + $0x68] sm:$0xff]  ;;  %v269_v10 = vld [vmem:[%s2368_s22 + $0x70] sm:$0xff] }
  0x18   :  { %1501 = vmatprep.subr.bf16.mxu0 %v1692_v0  ;;  %v1556_v9 = vpack.c.bf16 %v268_v8, %v267_v7  ;;  %v270_v11 = vld [vmem:[%s2368_s22 + $0x78] sm:$0xff]  ;;  %v348_v13 = vld [vmem:[%s2370_s30] sm:$0xff]  ;;  %v349_v14 = vld [vmem:[%s2370_s30 + $0x8] sm:$0xff] }
  0x19   :  { %1524 = vmatpush3.bf16.msra.mxu1 %v1523_v30  ;;  %v1559_v12 = vpack.c.bf16 %v270_v11, %v269_v10  ;;  %v1045_v15 = vld [vmem:[%s2371_s3] ss:$0 sm:$0xff]  ;;  %v1562_v17 = vpack.c.bf16 %v349_v14, %v348_v13  ;;  %v350_v20 = vld [vmem:[%s2370_s30 + $0x10] sm:$0xff]  ;;  %v351_v21 = vld [vmem:[%s2370_s30 + $0x18] sm:$0xff] }
  0x1a   :  { %1525 = vmatprep.subr.bf16.mxu1 %v1692_v0  ;;  %v1565_v22 = vpack.c.bf16 %v351_v21, %v350_v20  ;;  %v352_v23 = vld [vmem:[%s2370_s30 + $0x20] sm:$0xff]  ;;  %v353_v24 = vld [vmem:[%s2370_s30 + $0x28] sm:$0xff]  ;;  %v354_v26 = vld [vmem:[%s2370_s30 + $0x30] sm:$0xff] }
  0x1b   :  { %1503 = vmatpush3.bf16.msra.mxu0 %v1502_v27  ;;  %v1568_v25 = vpack.c.bf16 %v353_v24, %v352_v23  ;;  %v355_v27 = vld [vmem:[%s2370_s30 + $0x38] sm:$0xff]  ;;  %v356_v29 = vld [vmem:[%s2370_s30 + $0x40] sm:$0xff]  ;;  %v357_v30 = vld [vmem:[%s2370_s30 + $0x48] sm:$0xff] }
  0x1c   :  { %1504 = vmatprep.subr.bf16.mxu0 %v1692_v0  ;;  %v1571_v28 = vpack.c.bf16 %v355_v27, %v354_v26  ;;  %v1574_v31 = vpack.c.bf16 %v357_v30, %v356_v29  ;;  %v358_v32 = vld [vmem:[%s2370_s30 + $0x50] sm:$0xff]  ;;  %v360_v35 = vld [vmem:[%s2370_s30 + $0x60] sm:$0xff]  ;;  %v603_v63 = vld [vmem:[%s2343_s9 + $0x8] sm:$0xff] }
  0x1d   :  { %1527 = vmatpush3.bf16.msra.mxu1 %v1526_v36  ;;  %v361_v36 = vld [vmem:[%s2370_s30 + $0x68] sm:$0xff]  ;;  %v362_v38 = vld [vmem:[%s2370_s30 + $0x70] sm:$0xff]  ;;  %v1047_v41 = vld [vmem:[%s2340_s6] ss:$0 sm:$0xff] }
  0x1e   :  { %1528 = vmatprep.subr.bf16.mxu1 %v1692_v0  ;;  %v1580_v37 = vpack.c.bf16 %v361_v36, %v360_v35  ;;  %v1046_v44 = vld [vmem:[%s2341_s4] ss:$0 sm:$0xff]  ;;  %v604_v1 = vld [vmem:[%s2343_s9 + $0x10] sm:$0xff]  ;;  %v605_v3 = vld [vmem:[%s2343_s9 + $0x18] sm:$0xff] }
  0x1f   :  { %1506 = vmatpush3.bf16.msra.mxu0 %v1505_v33  ;;  %v359_v33 = vld [vmem:[%s2370_s30 + $0x58] sm:$0xff]  ;;  %v1048_v49 = vld [vmem:[%s2342_s8] ss:$0 sm:$0xff]  ;;  %v1589_v5 = vpack.c.bf16 %v605_v3, %v604_v1  ;;  %v607_v7 = vld [vmem:[%s2343_s9 + $0x28] sm:$0xff] }
  0x20   :  { %1507 = vmatprep.subr.bf16.mxu0 %v1692_v0  ;;  %v1577_v34 = vpack.c.bf16 %v359_v33, %v358_v32  ;;  %v609_v10 = vld [vmem:[%s2343_s9 + $0x38] sm:$0xff]  ;;  %v611_v13 = vld [vmem:[%s2343_s9 + $0x48] sm:$0xff]  ;;  %v728_v30 = vld [vmem:[%s2344_s13] sm:$0xff] }
  0x21   :  { %1530 = vmatpush3.bf16.msra.mxu1 %v1529_v42  ;;  %v615_v20 = vld [vmem:[%s2343_s9 + $0x68] sm:$0xff]  ;;  %v617_v23 = vld [vmem:[%s2343_s9 + $0x78] sm:$0xff]  ;;  %v1051_v33 = vld [vmem:[%s2345_s10] ss:$0 sm:$0xff] }
  0x22   :  { %1531 = vmatprep.subr.bf16.mxu1 %v1692_v0 }
  0x23   :  { %1509 = vmatpush3.bf16.msra.mxu0 %v1508_v39  ;;  %v363_v39 = vld [vmem:[%s2370_s30 + $0x78] sm:$0xff] }
  0x24   :  { %1510 = vmatprep.subr.bf16.mxu0 %v1692_v0  ;;  %v1583_v40 = vpack.c.bf16 %v363_v39, %v362_v38 }
  0x25   :  { %1533 = vmatpush3.bf16.msra.mxu1 %v1532_v48 }
  0x26   :  { %1534 = vmatprep.subr.bf16.mxu1 %v1692_v0 }
  0x27   :  { %1512 = vmatpush3.bf16.msra.mxu0 %v1511_v45 }
  0x28   :  { %1537 = vmatprep.subr.bf16.mxu0 %v1692_v0 }
  0x29   :  { %1536 = vmatpush3.bf16.msra.mxu1 %v1535_v55 }
  0x2a   :  { %1232 = vmatmul.mubr.f32.vlgmr.msra.gmra.mrb[0].mxu0 %v68_v51  ;;  %1561 = vmatprep.subr.bf16.mxu1 %v1692_v0 }
  0x2b   :  { %1539 = vmatpush3.bf16.msra.mxu0 %v1538_v52  ;;  %1301 = vmatprep.mubr.msk.f32.mxu0 %vm1693_vm0, %v1694_v4 }
  0x2c   :  { %1540 = vmatprep.subr.bf16.mxu0 %v1692_v0 }
  0x2f   :  { %1542 = vmatpush3.bf16.msra.mxu0 %v1541_v56 }
  0x30   :  { %1543 = vmatprep.subr.bf16.mxu0 %v1692_v0 }
  0x33   :  { %1545 = vmatpush3.bf16.msra.mxu0 %v1544_v59 }
  0x34   :  { %1546 = vmatprep.subr.bf16.mxu0 %v1692_v0 }
  0x37   :  { %1548 = vmatpush3.bf16.msra.mxu0 %v1547_v62  ;;  %v602_v62 = vld [vmem:[%s2343_s9] sm:$0xff] }
  0x38   :  { %1549 = vmatprep.subr.bf16.mxu0 %v1692_v0 }
  0x3b   :  { %1551 = vmatpush3.bf16.msra.mxu0 %v1550_v2  ;;  %v1586_v2 = vpack.c.bf16 %v603_v63, %v602_v62  ;;  %v823_v62 = vld [vmem:[%s2346_s15 + $0x8] sm:$0xff]  ;;  %v824_v63 = vld [vmem:[%s2346_s15 + $0x10] sm:$0xff] }
  0x3c   :  { %1552 = vmatprep.subr.bf16.mxu0 %v1692_v0 }
  0x3f   :  { %1554 = vmatpush3.bf16.msra.mxu0 %v1553_v6  ;;  %v606_v6 = vld [vmem:[%s2343_s9 + $0x20] sm:$0xff] }
  0x40   :  { %1555 = vmatprep.subr.bf16.mxu0 %v1692_v0  ;;  %v1592_v8 = vpack.c.bf16 %v607_v7, %v606_v6  ;;  %v827_v6 = vld [vmem:[%s2346_s15 + $0x28] sm:$0xff] }
  0x43   :  { %1557 = vmatpush3.bf16.msra.mxu0 %v1556_v9  ;;  %v608_v9 = vld [vmem:[%s2343_s9 + $0x30] sm:$0xff] }
  0x44   :  { %1558 = vmatprep.subr.bf16.mxu0 %v1692_v0  ;;  %v1595_v11 = vpack.c.bf16 %v609_v10, %v608_v9  ;;  %v829_v9 = vld [vmem:[%s2346_s15 + $0x38] sm:$0xff] }
  0x47   :  { %1560 = vmatpush3.bf16.msra.mxu0 %v1559_v12  ;;  %v610_v12 = vld [vmem:[%s2343_s9 + $0x40] sm:$0xff] }
  0x48   :  { %1339 = vmatprep.subr.mxu0 %v1694_v4  ;;  %v1598_v14 = vpack.c.bf16 %v611_v13, %v610_v12  ;;  %v831_v12 = vld [vmem:[%s2346_s15 + $0x48] sm:$0xff] }
  0xfd   :  { %v158_v16 = vpop.f32.mrb[0].mxu0 }
  0xfe   :  { %v1993_v18 = vadd.f32 %v1045_v15, %v158_v16  ;;  %v1233_v19 = vpop.f32.mrb[1].mxu0  ;;  %v612_v15 = vld [vmem:[%s2343_s9 + $0x50] sm:$0xff]  ;;  %v613_v16 = vld [vmem:[%s2343_s9 + $0x58] sm:$0xff] }
  0xff   :  { %v614_v19 = vld [vmem:[%s2343_s9 + $0x60] sm:$0xff] }
 0x100   :  { %1267 = vmatmul.mubr.f32.vlgmr.msra.gmra.mrb[0].mxu1 %v1993_v18  ;;  %1302 = vmatmul.mubr.f32.vlgmr.msra.gmra.mrb[2].mxu0 %v1993_v18  ;;  %v1604_v21 = vpack.c.bf16 %v615_v20, %v614_v19  ;;  %v835_v19 = vld [vmem:[%s2346_s15 + $0x68] sm:$0xff] }
 0x101   :  { %1563 = vmatpush3.bf16.msra.mxu1 %v1562_v17  ;;  %1336 = vmatprep.mubr.msk.f32.mxu1 %vm1693_vm0, %v1694_v4  ;;  %v1601_v17 = vpack.c.bf16 %v613_v16, %v612_v15  ;;  %v833_v15 = vld [vmem:[%s2346_s15 + $0x58] sm:$0xff] }
 0x102   :  { %1564 = vmatprep.subr.bf16.mxu1 %v1692_v0  ;;  %1341 = vmatprep.mubr.msk.f32.mxu0 %vm1693_vm0, %v1694_v4 }
 0x105   :  { %1566 = vmatpush3.bf16.msra.mxu1 %v1565_v22  ;;  %v616_v22 = vld [vmem:[%s2343_s9 + $0x70] sm:$0xff] }
 0x106   :  { %1567 = vmatprep.subr.bf16.mxu1 %v1692_v0  ;;  %v1607_v24 = vpack.c.bf16 %v617_v23, %v616_v22 }
 0x109   :  { %1569 = vmatpush3.bf16.msra.mxu1 %v1568_v25 }
 0x10a   :  { %1570 = vmatprep.subr.bf16.mxu1 %v1692_v0 }
 0x10d   :  { %1572 = vmatpush3.bf16.msra.mxu1 %v1571_v28 }
 0x10e   :  { %1573 = vmatprep.subr.bf16.mxu1 %v1692_v0 }
 0x111   :  { %1575 = vmatpush3.bf16.msra.mxu1 %v1574_v31  ;;  %v729_v31 = vld [vmem:[%s2344_s13 + $0x8] sm:$0xff] }
 0x112   :  { %1576 = vmatprep.subr.bf16.mxu1 %v1692_v0  ;;  %v1610_v32 = vpack.c.bf16 %v729_v31, %v728_v30  ;;  %v1052_v30 = vld [vmem:[%s2347_s11] ss:$0 sm:$0xff] }
 0x115   :  { %1578 = vmatpush3.bf16.msra.mxu1 %v1577_v34 }
 0x116   :  { %1579 = vmatprep.subr.bf16.mxu1 %v1692_v0 }
 0x119   :  { %1581 = vmatpush3.bf16.msra.mxu1 %v1580_v37 }
 0x11a   :  { %1582 = vmatprep.subr.bf16.mxu1 %v1692_v0 }
 0x11d   :  { %1584 = vmatpush3.bf16.msra.mxu1 %v1583_v40 }
 0x11e   :  { %1344 = vmatprep.subr.mxu1 %v1694_v4 }
 0x120   :  { %1337 = vmatmul.mubr.f32.vlgmr.msra.gmra.mrb[2].mxu1 %v1993_v18 }
 0x121   :  { %1346 = vmatprep.mubr.msk.f32.mxu1 %vm1693_vm0, %v1694_v4 }
 0x1d3   :  { %v251_v42 = vpop.f32.mrb[0].mxu1  ;;  %v344_v43 = vpop.f32.mrb[2].mxu0 }
 0x1d4   :  { %v345_v45 = vadd.f32 %v1047_v41, %v344_v43  ;;  %v1268_v46 = vpop.f32.mrb[1].mxu1  ;;  %v1303_v47 = vpop.f32.mrb[3].mxu0  ;;  %v252_v48 = vadd.f32 %v1046_v44, %v251_v42  ;;  %v730_v41 = vld [vmem:[%s2344_s13 + $0x10] sm:$0xff]  ;;  %v731_v42 = vld [vmem:[%s2344_s13 + $0x18] sm:$0xff]  ;;  %v732_v43 = vld [vmem:[%s2344_s13 + $0x20] sm:$0xff] }
 0x1d5   :  { %v733_v44 = vld [vmem:[%s2344_s13 + $0x28] sm:$0xff]  ;;  %v734_v46 = vld [vmem:[%s2344_s13 + $0x30] sm:$0xff]  ;;  %v735_v47 = vld [vmem:[%s2344_s13 + $0x38] sm:$0xff] }
 0x1d6   :  { %1340 = vmatpush3.xpose.msra.mxu0 %v345_v45  ;;  %v1616_v45 = vpack.c.bf16 %v733_v44, %v732_v43  ;;  %v949_v43 = vld [vmem:[%s2350_s19 + $0x10] sm:$0xff] }
 0x1d7   :  { %1585 = vmatprep.subr.bf16.mxu0 %v1692_v0 }
 0x1d9   :  { %1342 = vmatmul.mubr.f32.vlgmr.msra.gmra.mrb[4].mxu0 %v252_v48  ;;  %v1619_v48 = vpack.c.bf16 %v735_v47, %v734_v46  ;;  %v1055_v47 = vld [vmem:[%s2351_s16] ss:$0 sm:$0xff] }
 0x1da   :  { %1381 = vmatprep.mubr.msk.f32.mxu0 %vm1693_vm0, %v1694_v4  ;;  %1587 = vmatpush3.bf16.msra.mxu0 %v1586_v2  ;;  %v825_v2 = vld [vmem:[%s2346_s15 + $0x18] sm:$0xff] }
 0x1db   :  { %1588 = vmatprep.subr.bf16.mxu0 %v1692_v0  ;;  %v1637_v3 = vpack.c.bf16 %v825_v2, %v824_v63  ;;  %v957_v63 = vld [vmem:[%s2350_s19 + $0x50] sm:$0xff]  ;;  %v958_v2 = vld [vmem:[%s2350_s19 + $0x58] sm:$0xff] }
 0x1de   :  { %1590 = vmatpush3.bf16.msra.mxu0 %v1589_v5  ;;  %v826_v5 = vld [vmem:[%s2346_s15 + $0x20] sm:$0xff] }
 0x1df   :  { %1591 = vmatprep.subr.bf16.mxu0 %v1692_v0  ;;  %v1640_v7 = vpack.c.bf16 %v827_v6, %v826_v5  ;;  %v959_v5 = vld [vmem:[%s2350_s19 + $0x60] sm:$0xff]  ;;  %v960_v6 = vld [vmem:[%s2350_s19 + $0x68] sm:$0xff] }
 0x1e2   :  { %1593 = vmatpush3.bf16.msra.mxu0 %v1592_v8  ;;  %v828_v8 = vld [vmem:[%s2346_s15 + $0x30] sm:$0xff] }
 0x1e3   :  { %1594 = vmatprep.subr.bf16.mxu0 %v1692_v0  ;;  %v1643_v10 = vpack.c.bf16 %v829_v9, %v828_v8  ;;  %v961_v8 = vld [vmem:[%s2350_s19 + $0x70] sm:$0xff]  ;;  %v962_v9 = vld [vmem:[%s2350_s19 + $0x78] sm:$0xff] }
 0x1e6   :  { %1596 = vmatpush3.bf16.msra.mxu0 %v1595_v11  ;;  %v830_v11 = vld [vmem:[%s2346_s15 + $0x40] sm:$0xff] }
 0x1e7   :  { %1597 = vmatprep.subr.bf16.mxu0 %v1692_v0  ;;  %v1646_v13 = vpack.c.bf16 %v831_v12, %v830_v11 }
 0x1ea   :  { %1599 = vmatpush3.bf16.msra.mxu0 %v1598_v14  ;;  %v832_v14 = vld [vmem:[%s2346_s15 + $0x50] sm:$0xff] }
 0x1eb   :  { %1600 = vmatprep.subr.bf16.mxu0 %v1692_v0  ;;  %v1649_v16 = vpack.c.bf16 %v833_v15, %v832_v14 }
 0x1ee   :  { %1602 = vmatpush3.bf16.msra.mxu0 %v1601_v17  ;;  %v834_v17 = vld [vmem:[%s2346_s15 + $0x60] sm:$0xff] }
 0x1ef   :  { %1603 = vmatprep.subr.bf16.mxu0 %v1692_v0  ;;  %v1652_v20 = vpack.c.bf16 %v835_v19, %v834_v17 }
 0x1f2   :  { %1605 = vmatpush3.bf16.msra.mxu0 %v1604_v21 }
 0x1f3   :  { %v437_v50 = vpop.f32.mrb[2].mxu1  ;;  %1606 = vmatprep.subr.bf16.mxu0 %v1692_v0 }
 0x1f4   :  { %v438_v51 = vadd.f32 %v1048_v49, %v437_v50  ;;  %v1338_v52 = vpop.f32.mrb[3].mxu1  ;;  %v736_v49 = vld [vmem:[%s2344_s13 + $0x40] sm:$0xff]  ;;  %v737_v50 = vld [vmem:[%s2344_s13 + $0x48] sm:$0xff] }
 0x1f5   :  { %v1622_v52 = vpack.c.bf16 %v737_v50, %v736_v49 }
 0x1f6   :  { %1345 = vmatpush3.msk.msra.mxu1 %vm528_vm1, %v438_v51  ;;  %1608 = vmatpush3.bf16.msra.mxu0 %v1607_v24  ;;  %v738_v51 = vld [vmem:[%s2344_s13 + $0x50] sm:$0xff] }
 0x1f7   :  { %1609 = vmatprep.subr.bf16.mxu1 %v1692_v0  ;;  %1633 = vmatprep.subr.bf16.mxu0 %v1692_v0 }
 0x2ac   :  { %v507_v53 = vpop.f32.mrb[4].mxu0 }
 0x2ad   :  { %v511_v54 = vmul.f32 0.1, %v507_v53  ;;  %v1343_v55 = vpop.f32.mrb[5].mxu0  ;;  %v739_v53 = vld [vmem:[%s2344_s13 + $0x58] sm:$0xff] }
 0x2ae   :  { %v740_v55 = vld [vmem:[%s2344_s13 + $0x60] sm:$0xff] }
 0x2af   :  { %v513_v56 = vsel %vm512_vm2, %v511_v54, -inf }
 0x2b0   :  { %514 = vmax.xlane.f32.xlu0 %v513_v56  ;;  %v741_v56 = vld [vmem:[%s2344_s13 + $0x68] sm:$0xff] }
 0x33d   :  { %v515_v57 = vpop.xlane.xlu0 %514 }
 0x33e   :  { %v516_v58 = vsub.f32 %v511_v54, %v515_v57  ;;  %v1625_v54 = vpack.c.bf16 %v739_v53, %v738_v51  ;;  %v1628_v57 = vpack.c.bf16 %v741_v56, %v740_v55  ;;  %v951_v55 = vld [vmem:[%s2350_s19 + $0x20] sm:$0xff]  ;;  %v952_v56 = vld [vmem:[%s2350_s19 + $0x28] sm:$0xff] }
 0x340   :  { %v517_v59 = vmul.f32 1.442695, %v516_v58  ;;  %v742_v58 = vld [vmem:[%s2344_s13 + $0x70] sm:$0xff] }
 0x342   :  { %1684 = vpow2.f32 %v517_v59  ;;  %v743_v59 = vld [vmem:[%s2344_s13 + $0x78] sm:$0xff] }
 0x34c   :  { %v1685_v60 = vpop.eup %1684 }
 0x34d   :  { %v519_v61 = vsel %vm512_vm2, %v1685_v60, 0.0 }
 0x34e   :  { %520 = vadd.xlane.f32.xlu0 %v519_v61  ;;  %v822_v61 = vld [vmem:[%s2346_s15] sm:$0xff] }
 0x34f   :  { %v1634_v1 = vpack.c.bf16 %v823_v62, %v822_v61  ;;  %v955_v61 = vld [vmem:[%s2350_s19 + $0x40] sm:$0xff]  ;;  %v956_v62 = vld [vmem:[%s2350_s19 + $0x48] sm:$0xff] }
 0x3db   :  { %v521_v25 = vpop.xlane.xlu0 %520 }
 0x3dc   :  { %1686 = vrcp.f32 %v521_v25 }
 0x3e6   :  { %v1687_v26 = vpop.eup %1686 }
 0x3e7   :  { %v523_v27 = vmul.f32 %v1687_v26, %v1685_v60  ;;  %v1631_v60 = vpack.c.bf16 %v743_v59, %v742_v58  ;;  %v953_v58 = vld [vmem:[%s2350_s19 + $0x30] sm:$0xff]  ;;  %v954_v59 = vld [vmem:[%s2350_s19 + $0x38] sm:$0xff] }
 0x3e9   :  { %1347 = vmatmul.mubr.msk.f32.vlgmr.msra.gmra.mrb[4].mxu1 %vm524_vm3, %v523_v27 }
 0x3ea   :  { %1416 = vmatprep.mubr.msk.f32.mxu1 %vm1693_vm0, %v1694_v4  ;;  %1611 = vmatpush3.bf16.msra.mxu1 %v1610_v32  ;;  %v1053_v32 = vld [vmem:[%s2348_s12] ss:$0 sm:$0xff] }
 0x3eb   :  { %1612 = vmatprep.subr.bf16.mxu1 %v1692_v0 }
 0x4bc   :  { %v598_v28 = vpop.f32.mrb[4].mxu1 }
 0x4bd   :  { %v1348_v29 = vpop.f32.mrb[5].mxu1  ;;  %1382 = vmatmul.mubr.f32.vlgmr.msra.gmra.mrb[6].mxu0 %v598_v28 }
 0x4be   :  { %1451 = vmatprep.mubr.msk.f32.mxu0 %vm1693_vm0, %v1694_v4  ;;  %1635 = vmatpush3.bf16.msra.mxu0 %v1634_v1  ;;  %v1670_v1 = vpack.c.bf16 %v956_v62, %v955_v61 }
 0x4bf   :  { %1636 = vmatprep.subr.bf16.mxu0 %v1692_v0 }
 0x4c2   :  { %1638 = vmatpush3.bf16.msra.mxu0 %v1637_v3  ;;  %v1673_v3 = vpack.c.bf16 %v958_v2, %v957_v63 }
 0x4c3   :  { %1639 = vmatprep.subr.bf16.mxu0 %v1692_v0 }
 0x4c6   :  { %1641 = vmatpush3.bf16.msra.mxu0 %v1640_v7  ;;  %v1676_v7 = vpack.c.bf16 %v960_v6, %v959_v5 }
 0x4c7   :  { %1642 = vmatprep.subr.bf16.mxu0 %v1692_v0 }
 0x4ca   :  { %1644 = vmatpush3.bf16.msra.mxu0 %v1643_v10  ;;  %v1679_v10 = vpack.c.bf16 %v962_v9, %v961_v8 }
 0x4cb   :  { %1645 = vmatprep.subr.bf16.mxu0 %v1692_v0 }
 0x4ce   :  { %1647 = vmatpush3.bf16.msra.mxu0 %v1646_v13 }
 0x4cf   :  { %1648 = vmatprep.subr.bf16.mxu0 %v1692_v0 }
 0x4d2   :  { %1650 = vmatpush3.bf16.msra.mxu0 %v1649_v16 }
 0x4d3   :  { %1651 = vmatprep.subr.bf16.mxu0 %v1692_v0 }
 0x4d6   :  { %1653 = vmatpush3.bf16.msra.mxu0 %v1652_v20 }
 0x4d7   :  { %1654 = vmatprep.subr.bf16.mxu0 %v1692_v0 }
 0x590   :  { %v691_v34 = vpop.f32.mrb[6].mxu0 }
 0x591   :  { %v692_v35 = vadd.f32 %v1051_v33, %v691_v34  ;;  %v1383_v36 = vpop.f32.mrb[7].mxu0 }
 0x592   :  { %v837_v36 = vld [vmem:[%s2346_s15 + $0x78] sm:$0xff] }
 0x593   :  { %v2139_v37 = vadd.f32 %v692_v35, %v1993_v18  ;;  %v1613_v18 = vpack.c.bf16 %v731_v42, %v730_v41  ;;  %v836_v35 = vld [vmem:[%s2346_s15 + $0x70] sm:$0xff] }
 0x595   :  { %v696_v38 = vsel %vm528_vm1, %v2139_v37, 0.0  ;;  %v699_v39 = vmul.f32 %v2139_v37, %v2139_v37  ;;  %1614 = vmatpush3.bf16.msra.mxu1 %v1613_v18  ;;  %v948_v18 = vld [vmem:[%s2350_s19 + $0x8] sm:$0xff] }
 0x596   :  { %697 = vadd.xlane.f32.xlu1 %v696_v38  ;;  %1615 = vmatprep.subr.bf16.mxu1 %v1692_v0  ;;  %v1054_v38 = vld [vmem:[%s2349_s14] ss:$0 sm:$0xff] }
 0x597   :  { %v700_v40 = vsel %vm528_vm1, %v699_v39, 0.0 }
 0x599   :  { %1617 = vmatpush3.bf16.msra.mxu1 %v1616_v45  ;;  %v950_v45 = vld [vmem:[%s2350_s19 + $0x18] sm:$0xff] }
 0x59a   :  { %701 = vadd.xlane.f32.xlu1 %v700_v40  ;;  %1618 = vmatprep.subr.bf16.mxu1 %v1692_v0  ;;  %v1661_v46 = vpack.c.bf16 %v950_v45, %v949_v43 }
 0x59d   :  { %1620 = vmatpush3.bf16.msra.mxu1 %v1619_v48 }
 0x59e   :  { %1621 = vmatprep.subr.bf16.mxu1 %v1692_v0 }
 0x5a1   :  { %1623 = vmatpush3.bf16.msra.mxu1 %v1622_v52 }
 0x5a2   :  { %1624 = vmatprep.subr.bf16.mxu1 %v1692_v0 }
 0x5a5   :  { %1626 = vmatpush3.bf16.msra.mxu1 %v1625_v54 }
 0x5a6   :  { %1627 = vmatprep.subr.bf16.mxu1 %v1692_v0 }
 0x5a9   :  { %1629 = vmatpush3.bf16.msra.mxu1 %v1628_v57  ;;  %v1664_v57 = vpack.c.bf16 %v952_v56, %v951_v55 }
 0x5aa   :  { %1630 = vmatprep.subr.bf16.mxu1 %v1692_v0 }
 0x5ad   :  { %1632 = vmatpush3.bf16.msra.mxu1 %v1631_v60  ;;  %v1667_v60 = vpack.c.bf16 %v954_v59, %v953_v58 }
 0x5ae   :  { %1657 = vmatprep.subr.bf16.mxu1 %v1692_v0 }
 0x623   :  { %v698_v21 = vpop.xlane.xlu1 %697 }
 0x624   :  { %v704_v22 = vmul.f32 0.01, %v698_v21  ;;  %v1056_v21 = vld [vmem:[%s2352_s17] ss:$0 sm:$0xff] }
 0x626   :  { %v706_v24 = vmul.f32 %v704_v22, %v704_v22  ;;  %v708_v28 = vsub.f32 %v2139_v37, %v704_v22  ;;  %v1655_v37 = vpack.c.bf16 %v837_v36, %v836_v35 }
 0x627   :  { %v702_v23 = vpop.xlane.xlu1 %701 }
 0x628   :  { %v705_v25 = vmul.f32 0.01, %v702_v23  ;;  %1656 = vmatpush3.bf16.msra.mxu0 %v1655_v37 }
 0x62a   :  { %v707_v26 = vsub.f32 %v705_v25, %v706_v24  ;;  %v1058_v25 = vld [vmem:[%s2354_s20] ss:$0 sm:$0xff] }
 0x62c   :  { %v709_v27 = vadd.f32 1e-05, %v707_v26 }
 0x62e   :  { %1688 = vrsqrt.f32 %v709_v27 }
 0x638   :  { %v1689_v29 = vpop.eup %1688 }
 0x639   :  { %v711_v31 = vmul.f32 %v1689_v29, %v708_v28 }
 0x63b   :  { %v719_v33 = vmul.f32 %v1052_v30, %v711_v31 }
 0x63d   :  { %v727_v34 = vadd.f32 %v1053_v32, %v719_v33 }
 0x63f   :  { %1417 = vmatmul.mubr.f32.vlgmr.msra.gmra.mrb[6].mxu1 %v727_v34 }
 0x640   :  { %1486 = vmatprep.mubr.msk.f32.mxu1 %vm1693_vm0, %v1694_v4  ;;  %v947_v4 = vld [vmem:[%s2350_s19] sm:$0xff] }
 0x641   :  { %v1658_v44 = vpack.c.bf16 %v948_v18, %v947_v4 }
 0x643   :  { %1659 = vmatpush3.bf16.msra.mxu1 %v1658_v44 }
 0x644   :  { %1660 = vmatprep.subr.bf16.mxu1 %v1692_v0 }
 0x647   :  { %1662 = vmatpush3.bf16.msra.mxu1 %v1661_v46 }
 0x648   :  { %1663 = vmatprep.subr.bf16.mxu1 %v1692_v0 }
 0x64b   :  { %1665 = vmatpush3.bf16.msra.mxu1 %v1664_v57 }
 0x64c   :  { %1666 = vmatprep.subr.bf16.mxu1 %v1692_v0 }
 0x64f   :  { %1668 = vmatpush3.bf16.msra.mxu1 %v1667_v60 }
 0x650   :  { %1669 = vmatprep.subr.bf16.mxu1 %v1692_v0 }
 0x653   :  { %1671 = vmatpush3.bf16.msra.mxu1 %v1670_v1 }
 0x654   :  { %1672 = vmatprep.subr.bf16.mxu1 %v1692_v0 }
 0x657   :  { %1674 = vmatpush3.bf16.msra.mxu1 %v1673_v3 }
 0x658   :  { %1675 = vmatprep.subr.bf16.mxu1 %v1692_v0 }
 0x65b   :  { %1677 = vmatpush3.bf16.msra.mxu1 %v1676_v7 }
 0x65c   :  { %1678 = vmatprep.subr.bf16.mxu1 %v1692_v0  ;;  %v1057_v0 = vld [vmem:[%s2353_s18] ss:$0 sm:$0xff] }
 0x65f   :  { %1680 = vmatpush3.bf16.msra.mxu1 %v1679_v10 }
 0x712   :  { %v817_v39 = vpop.f32.mrb[6].mxu1 }
 0x713   :  { %v818_v40 = vadd.f32 %v1054_v38, %v817_v39  ;;  %v1418_v41 = vpop.f32.mrb[7].mxu1 }
 0x715   :  { %v821_v42 = vmax.f32 %v818_v40, 0.0 }
 0x717   :  { %1452 = vmatmul.mubr.f32.vlgmr.msra.gmra.mrb[8].mxu0 %v821_v42 }
 0x7ea   :  { %v911_v48 = vpop.f32.mrb[8].mxu0 }
 0x7eb   :  { %v912_v49 = vadd.f32 %v1055_v47, %v911_v48  ;;  %v1453_v50 = vpop.f32.mrb[9].mxu0 }
 0x7ed   :  { %v915_v51 = vadd.f32 %v912_v49, %v727_v34 }
 0x7ef   :  { %v916_v52 = vsel %vm528_vm1, %v915_v51, 0.0  ;;  %v919_v53 = vmul.f32 %v915_v51, %v915_v51 }
 0x7f0   :  { %917 = vadd.xlane.f32.xlu0 %v916_v52 }
 0x7f1   :  { %v920_v54 = vsel %vm528_vm1, %v919_v53, 0.0 }
 0x7f2   :  { %921 = vadd.xlane.f32.xlu1 %v920_v54 }
 0x87d   :  { %v918_v11 = vpop.xlane.xlu0 %917 }
 0x87e   :  { %v923_v12 = vmul.f32 0.01, %v918_v11 }
 0x87f   :  { %v922_v13 = vpop.xlane.xlu1 %921 }
 0x880   :  { %v925_v14 = vmul.f32 %v923_v12, %v923_v12  ;;  %v924_v15 = vmul.f32 0.01, %v922_v13  ;;  %v927_v19 = vsub.f32 %v915_v51, %v923_v12 }
 0x882   :  { %v926_v16 = vsub.f32 %v924_v15, %v925_v14 }
 0x884   :  { %v928_v17 = vadd.f32 1e-05, %v926_v16 }
 0x886   :  { %1690 = vrsqrt.f32 %v928_v17 }
 0x890   :  { %v1691_v20 = vpop.eup %1690 }
 0x891   :  { %v930_v22 = vmul.f32 %v1691_v20, %v927_v19 }
 0x893   :  { %v938_v23 = vmul.f32 %v1056_v21, %v930_v22 }
 0x895   :  { %v946_v24 = vadd.f32 %v1057_v0, %v938_v23 }
 0x897   :  { %1487 = vmatmul.mubr.f32.vlgmr.msra.gmra.mrb[8].mxu1 %v946_v24 }
 0x96a   :  { %v1036_v26 = vpop.f32.mrb[8].mxu1 }
 0x96b   :  { %v1037_v27 = vadd.f32 %v1058_v25, %v1036_v26  ;;  %v1488_v28 = vpop.f32.mrb[9].mxu1 }
 0x96d   :  { %1040 = vst [vmem:[%s2355_s21] sm:$0xf] %v1037_v27 }

// kernel: classifier_forward.3
= control target key start
LH: loop header
LB: loop body
LE: loop exit
PB: predicated region body
PF: predicated region fallthrough
CT: control target
= control target key end

     0   :  { %s2166_s27 = smov 0   ;;  %s2861_s0 = inlined_call_operand.vmem [shape: f32[256,32], index: 0, kind: input, shape index: {}]   ;;  %s2862_s1 = inlined_call_operand.vmem [shape: f32[4,256], index: 1, kind: input, shape index: {}]   ;;  %s2863_s2 = inlined_call_operand.vmem [shape: f32[32,32], index: 2, kind: input, shape index: {}]   ;;  %s2864_s3 = inlined_call_operand.vmem [shape: f32[1,32], index: 3, kind: input, shape index: {}]   ;;  %s2865_s4 = inlined_call_operand.vmem [shape: f32[32,1024], index: 4, kind: input, shape index: {}]   ;;  %s2866_s5 = inlined_call_operand.vmem [shape: f32[1,1024], index: 5, kind: input, shape index: {}]   ;;  %s2867_s6 = inlined_call_operand.vmem [shape: f32[1024,128], index: 6, kind: input, shape index: {}]   ;;  %s2868_s7 = inlined_call_operand.vmem [shape: f32[1,128], index: 7, kind: input, shape index: {}]   ;;  %s2869_s8 = inlined_call_operand.vmem [shape: f32[4,128], index: 8, kind: output, shape index: {}]  }
   0x1 LB: > { %s2172_s28 = sadd.s32 4294967295, %s2114_s27   ;;  %p1549_p0 = scmp.ge.s32.totalorder %s2114_s27, 1  ;;  %s2114_s27 = sphi %s2166_s27, %s18_s27  }
   0x2   : > { %p267_p1 = scmp.lt.s32.totalorder %s2114_s27, 3 }
   0x4   : > { %p268_p2 = pnand %p1549_p0, %p267_p1 }
   0x5   : > { %s1550_s29 = sshll.u32 (!%p268_p2), %s2172_s28, 4  ;;  %p306_p3 = scmp.lt.s32.totalorder (!%p268_p2), %s2172_s28, 1 }
   0x6   : > { %271 = sbr.rel (%p268_p2) target bundleno = 1000 (0x3e8), region = 52  ;;  %p301_p4 = scmp.lt.s32.totalorder (!%p268_p2), %s1550_s29, 31 }
   0x7   : > { %p1553_p5 = scmp.ne.s32.totalorder (!%p268_p2), %s2172_s28, 0 }
   0xd   : > { %s307_s30 = scalar_select %p306_p3, %s2172_s28, 1 }
   0xe   : > { %s2871_s29 = smov (!%p301_p4, %s1550_s29), 31  ;;  %313 = sbr.rel (%p1553_p5) target bundleno = 21 (0x15), region = 56 }
   0xf   : > { %s1552_s9 = sshll.u32 %s307_s30, 2  ;;  %s1551_s10 = sshll.u32 %s2871_s29, 3  ;;  %vm314_vm0 = vcmask (!%p1553_p5), 257024   ;;  %v2116_v0 = vmov (!%p1553_p5), 0.0  }
  0x10   : > { %s2182_s13 = scalar_lea.vmem %s2862_s1, %s1552_s9  ;;  %s2187_s16 = scalar_lea.vmem %s2861_s0, %s1551_s10  ;;  %315 = vst.msk [vmem:[#allocation2] sm:$0xf] (!%p1553_p5), %vm314_vm0, %v2116_v0 }
  0x15 PF: > { %v332_v1 = vld [vmem:[%s2863_s2] sm:$0xff]  ;;  %v333_v2 = vld [vmem:[%s2863_s2 + $0x8] sm:$0xff]  ;;  %v334_v3 = vld [vmem:[%s2863_s2 + $0x10] sm:$0xff]  ;;  %vm343_vm1 = vcmask 261120   ;;  %v2117_v23 = vmov 0.0|0.0   ;;  %vm2118_vm2 = vmmov 0  }
  0x16   : > { %v1839_v4 = vpack.c.bf16 %v333_v2, %v332_v1  ;;  %v335_v5 = vld [vmem:[%s2863_s2 + $0x18] sm:$0xff]  ;;  %v316_v6 = vld [vmem:[%s2187_s16] sm:$0xff]  ;;  %v317_v8 = vld [vmem:[%s2187_s16 + $0x8] sm:$0xff]  ;;  %1847 = vmatprep.subr.bf16.mxu1 %v2117_v23  ;;  %v2119_v24 = vmov 0.0   ;;  %vm722_vm3 = vcmask 257024   ;;  %p1587_p6 = scmp.ne.s32.totalorder %s2172_s28, 1 }
  0x17   : > { %v1843_v7 = vpack.c.bf16 %v335_v5, %v334_v3  ;;  %1780 = vmatprep.mubr.msk.f32.mxu0 %vm343_vm1, %v316_v6  ;;  %v318_v9 = vld [vmem:[%s2187_s16 + $0x10] sm:$0xff]  ;;  %v319_v10 = vld [vmem:[%s2187_s16 + $0x18] sm:$0xff]  ;;  %v320_v11 = vld [vmem:[%s2187_s16 + $0x20] sm:$0xff]  ;;  %1836 = vmatprep.mubr.msk.f32.mxu1 %vm2118_vm2, %v2119_v24 }
  0x18   : > { %1840 = vmatprep.subr.bf16.mxu0 %v1839_v4  ;;  %v321_v12 = vld [vmem:[%s2187_s16 + $0x28] sm:$0xff]  ;;  %v322_v13 = vld [vmem:[%s2187_s16 + $0x30] sm:$0xff]  ;;  %v323_v14 = vld [vmem:[%s2187_s16 + $0x38] sm:$0xff] }
  0x19   : > { %1842 = vmatpush3.bf16.msra.mxu0 %v1839_v4  ;;  %v324_v15 = vld [vmem:[%s2187_s16 + $0x40] sm:$0xff]  ;;  %v325_v16 = vld [vmem:[%s2187_s16 + $0x48] sm:$0xff]  ;;  %v326_v17 = vld [vmem:[%s2187_s16 + $0x50] sm:$0xff] }
  0x1a   : > { %1844 = vmatprep.subr.bf16.mxu0 %v1843_v7  ;;  %v327_v18 = vld [vmem:[%s2187_s16 + $0x58] sm:$0xff]  ;;  %v328_v19 = vld [vmem:[%s2187_s16 + $0x60] sm:$0xff]  ;;  %v329_v20 = vld [vmem:[%s2187_s16 + $0x68] sm:$0xff] }
  0x1b   : > { %v330_v21 = vld [vmem:[%s2187_s16 + $0x70] sm:$0xff]  ;;  %v331_v22 = vld [vmem:[%s2187_s16 + $0x78] sm:$0xff]  ;;  %v2238_v25 = vld [vmem:[%s2864_s3] ss:$0 sm:$0xff] }
  0x1d   : > { %1846 = vmatpush3.bf16.msra.mxu0 %v1843_v7 }
  0x20   : > { %1781 = vmatmul.mubr.msk.f32.vlgmr.msra.gmra.mrb[0].mxu0 %vm343_vm1, %v317_v8 }
  0x21   : > { %1783 = vmatprep.mubr.msk.f32.mxu0 %vm343_vm1, %v318_v9 }
  0x24   : > { %1784 = vmatmul.mubr.msk.f32.gmra.mrb[2].mxu0 %vm343_vm1, %v319_v10 }
  0x25   : > { %1786 = vmatprep.mubr.msk.f32.mxu0 %vm343_vm1, %v320_v11 }
  0x28   : > { %1787 = vmatmul.mubr.msk.f32.gmra.mrb[4].mxu0 %vm343_vm1, %v321_v12 }
  0x29   : > { %1789 = vmatprep.mubr.msk.f32.mxu0 %vm343_vm1, %v322_v13 }
  0x2c   : > { %1790 = vmatmul.mubr.msk.f32.gmra.mrb[6].mxu0 %vm343_vm1, %v323_v14 }
  0x2d   : > { %1792 = vmatprep.mubr.msk.f32.mxu0 %vm343_vm1, %v324_v15 }
  0x30   : > { %1793 = vmatmul.mubr.msk.f32.gmra.mrb[8].mxu0 %vm343_vm1, %v325_v16 }
  0x31   : > { %1795 = vmatprep.mubr.msk.f32.mxu0 %vm343_vm1, %v326_v17 }
  0x34   : > { %1796 = vmatmul.mubr.msk.f32.gmra.mrb[10].mxu0 %vm343_vm1, %v327_v18 }
  0x35   : > { %1798 = vmatprep.mubr.msk.f32.mxu0 %vm343_vm1, %v328_v19 }
  0x38   : > { %1799 = vmatmul.mubr.msk.f32.gmra.mrb[12].mxu0 %vm343_vm1, %v329_v20 }
  0x39   : > { %1801 = vmatprep.mubr.msk.f32.mxu0 %vm343_vm1, %v330_v21 }
  0x3c   : > { %1802 = vmatmul.mubr.msk.f32.gmra.mrb[14].mxu0 %vm343_vm1, %v331_v22 }
  0xf3   : > { %v1782_v26 = vpop.f32.mrb[0].mxu0 }
  0xf4   : > { %v2241_v27 = vadd.f32 %v1782_v26, %v2238_v25  ;;  %v458_v28 = vpop.f32.mrb[1].mxu0 }
  0xf5   : > { %v2244_v29 = vadd.f32 %v2238_v25, %v458_v28 }
  0xf6   : > { %v1572_v30 = vmul.f32 -1.442695, %v2241_v27 }
  0xf7   : > { %v1571_v31 = vmul.f32 -1.442695, %v2244_v29  ;;  %v1785_v32 = vpop.f32.mrb[2].mxu0 }
  0xf8   : > { %2044 = vpow2.f32 %v1572_v30  ;;  %v2249_v33 = vadd.f32 %v1785_v32, %v2238_v25  ;;  %v468_v34 = vpop.f32.mrb[3].mxu0 }
  0xf9   : > { %2046 = vpow2.f32 %v1571_v31  ;;  %v2252_v35 = vadd.f32 %v2238_v25, %v468_v34 }
  0xfa   : > { %v1574_v36 = vmul.f32 -1.442695, %v2249_v33 }
  0xfb   : > { %v1573_v37 = vmul.f32 -1.442695, %v2252_v35  ;;  %v1788_v38 = vpop.f32.mrb[4].mxu0 }
  0xfc   : > { %2048 = vpow2.f32 %v1574_v36  ;;  %v2257_v39 = vadd.f32 %v1788_v38, %v2238_v25  ;;  %v478_v40 = vpop.f32.mrb[5].mxu0 }
  0xfd   : > { %2050 = vpow2.f32 %v1573_v37  ;;  %v2260_v41 = vadd.f32 %v2238_v25, %v478_v40 }
  0xfe   : > { %v1576_v42 = vmul.f32 -1.442695, %v2257_v39 }
  0xff   : > { %v1575_v43 = vmul.f32 -1.442695, %v2260_v41  ;;  %v1791_v44 = vpop.f32.mrb[6].mxu0 }
 0x100   : > { %2052 = vpow2.f32 %v1576_v42  ;;  %v2265_v45 = vadd.f32 %v1791_v44, %v2238_v25  ;;  %v488_v46 = vpop.f32.mrb[7].mxu0 }
 0x101   : > { %2054 = vpow2.f32 %v1575_v43  ;;  %v2268_v47 = vadd.f32 %v2238_v25, %v488_v46 }
 0x102   : > { %v2045_v48 = vpop.eup %2044  ;;  %v1578_v49 = vmul.f32 -1.442695, %v2265_v45 }
 0x103   : > { %v2047_v50 = vpop.eup %2046  ;;  %v586_v51 = vadd.f32 1.0, %v2045_v48  ;;  %v1577_v52 = vmul.f32 -1.442695, %v2268_v47  ;;  %v1794_v53 = vpop.f32.mrb[8].mxu0 }
 0x104   : > { %v585_v54 = vadd.f32 1.0, %v2047_v50  ;;  %2056 = vpow2.f32 %v1578_v49  ;;  %v2273_v55 = vadd.f32 %v1794_v53, %v2238_v25  ;;  %v498_v56 = vpop.f32.mrb[9].mxu0 }
 0x105   : > { %2058 = vrcp.f32 %v586_v51  ;;  %v2276_v57 = vadd.f32 %v2238_v25, %v498_v56 }
 0x106   : > { %v2049_v58 = vpop.eup %2048  ;;  %2060 = vrcp.f32 %v585_v54  ;;  %v1580_v59 = vmul.f32 -1.442695, %v2273_v55 }
 0x107   : > { %v2051_v60 = vpop.eup %2050  ;;  %v588_v61 = vadd.f32 1.0, %v2049_v58  ;;  %2062 = vpow2.f32 %v1577_v52  ;;  %v1579_v62 = vmul.f32 -1.442695, %v2276_v57  ;;  %v1797_v63 = vpop.f32.mrb[10].mxu0 }
 0x108   : > { %v587_v0 = vadd.f32 1.0, %v2051_v60  ;;  %2064 = vpow2.f32 %v1580_v59  ;;  %v2281_v1 = vadd.f32 %v1797_v63, %v2238_v25  ;;  %v508_v2 = vpop.f32.mrb[11].mxu0 }
 0x109   : > { %2066 = vrcp.f32 %v588_v61  ;;  %v2284_v3 = vadd.f32 %v2238_v25, %v508_v2 }
 0x10a   : > { %v2053_v4 = vpop.eup %2052  ;;  %2068 = vrcp.f32 %v587_v0  ;;  %v1582_v5 = vmul.f32 -1.442695, %v2281_v1 }
 0x10b   : > { %v2055_v6 = vpop.eup %2054  ;;  %v590_v7 = vadd.f32 1.0, %v2053_v4  ;;  %2070 = vpow2.f32 %v1579_v62  ;;  %v1581_v8 = vmul.f32 -1.442695, %v2284_v3  ;;  %v1800_v9 = vpop.f32.mrb[12].mxu0 }
 0x10c   : > { %v589_v10 = vadd.f32 1.0, %v2055_v6  ;;  %2072 = vpow2.f32 %v1582_v5  ;;  %v2289_v11 = vadd.f32 %v1800_v9, %v2238_v25  ;;  %v518_v12 = vpop.f32.mrb[13].mxu0 }
 0x10d   : > { %2074 = vrcp.f32 %v590_v7  ;;  %v2292_v13 = vadd.f32 %v2238_v25, %v518_v12 }
 0x10e   : > { %v2057_v14 = vpop.eup %2056  ;;  %2076 = vrcp.f32 %v589_v10  ;;  %v1584_v15 = vmul.f32 -1.442695, %v2289_v11 }
 0x10f   : > { %v2059_v16 = vpop.eup %2058  ;;  %v592_v17 = vadd.f32 1.0, %v2057_v14  ;;  %2078 = vpow2.f32 %v1581_v8  ;;  %v1583_v18 = vmul.f32 -1.442695, %v2292_v13  ;;  %v1803_v19 = vpop.f32.mrb[14].mxu0 }
 0x110   : > { %v2061_v20 = vpop.eup %2060  ;;  %v634_v21 = vmul.f32 %v2059_v16, %v2241_v27  ;;  %2080 = vpow2.f32 %v1584_v15  ;;  %v2298_v22 = vadd.f32 %v1803_v19, %v2238_v25  ;;  %v528_v24 = vpop.f32.mrb[15].mxu0 }
 0x111   : > { %v2063_v26 = vpop.eup %2062  ;;  %v633_v28 = vmul.f32 %v2061_v20, %v2244_v29  ;;  %2082 = vrcp.f32 %v592_v17  ;;  %v2302_v30 = vadd.f32 %v2238_v25, %v528_v24  ;;  %v650_v20 = vld [vmem:[%s2182_s13] sm:$0xf] }
 0x112   : > { %v2065_v31 = vpop.eup %2064  ;;  %v591_v32 = vadd.f32 1.0, %v2063_v26  ;;  %2084 = vpow2.f32 %v1583_v18  ;;  %v1586_v34 = vmul.f32 -1.442695, %v2298_v22 }
 0x113   : > { %v2067_v36 = vpop.eup %2066  ;;  %v594_v37 = vadd.f32 1.0, %v2065_v31  ;;  %v1585_v27 = vmul.f32 -1.442695, %v2302_v30  ;;  %v1848_v38 = vpack.c.bf16 %v634_v21, %v633_v28  ;;  %v649_v21 = vld [vmem:[#allocation2] sm:$0xf]  ;;  %v732_v28 = vld [vmem:[%s2865_s4 + $0x18] sm:$0xff] (!%p1587_p6) }
 0x114   : > { %v2069_v40 = vpop.eup %2068  ;;  %v636_v42 = vmul.f32 %v2067_v36, %v2249_v33  ;;  %2086 = vrcp.f32 %v591_v32  ;;  %v740_v31 = vld [vmem:[%s2865_s4 + $0x58] sm:$0xff] (!%p1587_p6)  ;;  %v729_v32 = vld [vmem:[%s2865_s4] sm:$0xff] (!%p1587_p6)  ;;  %v2120_v36 = vmov (!%p1587_p6), 0.0  }
 0x115   : > { %v2071_v43 = vpop.eup %2070  ;;  %v635_v29 = vmul.f32 %v2069_v40, %v2252_v35  ;;  %2088 = vrcp.f32 %v594_v37  ;;  %1849 = vmatpush3.bf16.msra.mxu1 %v1848_v38  ;;  %870 = vmatprep.mubr.f32.mxu0 (!%p1587_p6), %v2120_v36  ;;  %v1879_v37 = vpack.c.bf16 (!%p1587_p6), %v740_v31, %v732_v28  ;;  %v731_v38 = vld [vmem:[%s2865_s4 + $0x10] sm:$0xff] (!%p1587_p6)  ;;  %v1093_v31 = vld [vmem:[%s2867_s6 + $0x18] sm:$0xff] (!%p1587_p6) }
 0x116   : > { %v2073_v25 = vpop.eup %2072  ;;  %v593_v44 = vadd.f32 1.0, %v2071_v43  ;;  %2090 = vpow2.f32 %v1586_v34  ;;  %1850 = vmatprep.subr.bf16.mxu1 %v2117_v23  ;;  %v737_v34 = vld [vmem:[%s2865_s4 + $0x40] sm:$0xff] (!%p1587_p6)  ;;  %v739_v40 = vld [vmem:[%s2865_s4 + $0x50] sm:$0xff] (!%p1587_p6) }
 0x117   : > { %v2075_v46 = vpop.eup %2074  ;;  %v596_v48 = vadd.f32 1.0, %v2073_v25  ;;  %2092 = vpow2.f32 %v1585_v27  ;;  %v1851_v49 = vpack.c.bf16 %v636_v42, %v635_v29  ;;  %v1873_v27 = vpack.c.bf16 (!%p1587_p6), %v737_v34, %v729_v32  ;;  %v746_v42 = vld [vmem:[%s2865_s4 + $0x88] sm:$0xff] (!%p1587_p6)  ;;  %v748_v25 = vld [vmem:[%s2865_s4 + $0x98] sm:$0xff] (!%p1587_p6)  ;;  %v1124_v32 = vld [vmem:[%s2867_s6 + $0x110] sm:$0xff] (!%p1587_p6) }
 0x118   : > { %v2077_v50 = vpop.eup %2076  ;;  %v638_v51 = vmul.f32 %v2075_v46, %v2257_v39  ;;  %2094 = vrcp.f32 %v593_v44  ;;  %v1881_v43 = vpack.c.bf16 (!%p1587_p6), %v739_v40, %v731_v38  ;;  %v754_v29 = vld [vmem:[%s2865_s4 + $0xc8] sm:$0xff] (!%p1587_p6)  ;;  %v756_v44 = vld [vmem:[%s2865_s4 + $0xd8] sm:$0xff] (!%p1587_p6)  ;;  %v1142_v38 = vld [vmem:[%s2867_s6 + $0x1a0] sm:$0xff] (!%p1587_p6) }
 0x119   : > { %v2079_v33 = vpop.eup %2078  ;;  %v637_v52 = vmul.f32 %v2077_v50, %v2260_v41  ;;  %2096 = vrcp.f32 %v596_v48  ;;  %1852 = vmatpush3.bf16.msra.mxu1 %v1851_v49  ;;  %v1875_v46 = vpack.c.bf16 (!%p1587_p6), %v754_v29, %v746_v42  ;;  %v1883_v48 = vpack.c.bf16 (!%p1587_p6), %v756_v44, %v748_v25  ;;  %v745_v49 = vld [vmem:[%s2865_s4 + $0x80] sm:$0xff] (!%p1587_p6)  ;;  %v1143_v40 = vld [vmem:[%s2867_s6 + $0x1a8] sm:$0xff] (!%p1587_p6) }
 0x11a   : > { %v2081_v35 = vpop.eup %2080  ;;  %v595_v53 = vadd.f32 1.0, %v2079_v33  ;;  %1853 = vmatprep.subr.bf16.mxu1 %v2117_v23  ;;  %v753_v50 = vld [vmem:[%s2865_s4 + $0xc0] sm:$0xff] (!%p1587_p6)  ;;  %v1095_v44 = vld [vmem:[%s2867_s6 + $0x28] sm:$0xff] (!%p1587_p6) }
 0x11b   : > { %v2083_v54 = vpop.eup %2082  ;;  %v598_v56 = vadd.f32 1.0, %v2081_v35  ;;  %v1854_v58 = vpack.c.bf16 %v638_v51, %v637_v52  ;;  %v747_v51 = vld [vmem:[%s2865_s4 + $0x90] sm:$0xff] (!%p1587_p6)  ;;  %v1877_v33 = vpack.c.bf16 (!%p1587_p6), %v753_v50, %v745_v49  ;;  %v734_v35 = vld [vmem:[%s2865_s4 + $0x28] sm:$0xff] (!%p1587_p6)  ;;  %v1094_v25 = vld [vmem:[%s2867_s6 + $0x20] sm:$0xff] (!%p1587_p6) }
 0x11c   : > { %v2085_v59 = vpop.eup %2084  ;;  %2098 = vrcp.f32 %v595_v53  ;;  %v640_v60 = vmul.f32 %v2083_v54, %v2265_v45  ;;  %v755_v52 = vld [vmem:[%s2865_s4 + $0xd0] sm:$0xff] (!%p1587_p6)  ;;  %v1127_v49 = vld [vmem:[%s2867_s6 + $0x128] sm:$0xff] (!%p1587_p6) }
 0x11d   : > { %2100 = vrcp.f32 %v598_v56  ;;  %v597_v61 = vadd.f32 1.0, %v2085_v59  ;;  %1855 = vmatpush3.bf16.msra.mxu1 %v1854_v58  ;;  %v1885_v53 = vpack.c.bf16 (!%p1587_p6), %v755_v52, %v747_v51  ;;  %v742_v56 = vld [vmem:[%s2865_s4 + $0x68] sm:$0xff] (!%p1587_p6)  ;;  %v733_v58 = vld [vmem:[%s2865_s4 + $0x20] sm:$0xff] (!%p1587_p6)  ;;  %v1112_v50 = vld [vmem:[%s2867_s6 + $0xb0] sm:$0xff] (!%p1587_p6) }
 0x11e   : > { %v2087_v39 = vpop.eup %2086  ;;  %1856 = vmatprep.subr.bf16.mxu1 %v2117_v23  ;;  %v741_v59 = vld [vmem:[%s2865_s4 + $0x60] sm:$0xff] (!%p1587_p6)  ;;  %v1113_v51 = vld [vmem:[%s2867_s6 + $0xb8] sm:$0xff] (!%p1587_p6) }
 0x11f   : > { %v2089_v41 = vpop.eup %2088  ;;  %v639_v62 = vmul.f32 %v2087_v39, %v2268_v47  ;;  %2102 = vrcp.f32 %v597_v61  ;;  %v736_v61 = vld [vmem:[%s2865_s4 + $0x38] sm:$0xff] (!%p1587_p6) }
 0x120   : > { %v2091_v63 = vpop.eup %2090  ;;  %v642_v2 = vmul.f32 %v2089_v41, %v2273_v55  ;;  %v744_v39 = vld [vmem:[%s2865_s4 + $0x78] sm:$0xff] (!%p1587_p6)  ;;  %v735_v41 = vld [vmem:[%s2865_s4 + $0x30] sm:$0xff] (!%p1587_p6) }
 0x121   : > { %v2093_v0 = vpop.eup %2092  ;;  %v600_v4 = vadd.f32 1.0, %v2091_v63  ;;  %v1857_v5 = vpack.c.bf16 %v640_v60, %v639_v62  ;;  %v1887_v60 = vpack.c.bf16 (!%p1587_p6), %v742_v56, %v734_v35  ;;  %v1889_v62 = vpack.c.bf16 (!%p1587_p6), %v741_v59, %v733_v58  ;;  %v1145_v52 = vld [vmem:[%s2867_s6 + $0x1b8] sm:$0xff] (!%p1587_p6)  ;;  %v1096_v56 = vld [vmem:[%s2867_s6 + $0x30] sm:$0xff] (!%p1587_p6) }
 0x122   : > { %v2095_v6 = vpop.eup %2094  ;;  %v599_v7 = vadd.f32 1.0, %v2093_v0  ;;  %v1895_v63 = vpack.c.bf16 (!%p1587_p6), %v744_v39, %v736_v61  ;;  %v743_v0 = vld [vmem:[%s2865_s4 + $0x70] sm:$0xff] (!%p1587_p6)  ;;  %v1913_v35 = vpack.c.bf16 (!%p1587_p6), %v1095_v44, %v1094_v25  ;;  %v1097_v58 = vld [vmem:[%s2867_s6 + $0x38] sm:$0xff] (!%p1587_p6)  ;;  %v1114_v39 = vld [vmem:[%s2867_s6 + $0xc0] sm:$0xff] (!%p1587_p6) }
 0x123   : > { %v2097_v8 = vpop.eup %2096  ;;  %v641_v45 = vmul.f32 %v2095_v6, %v2276_v57  ;;  %2104 = vrcp.f32 %v600_v4  ;;  %1858 = vmatpush3.bf16.msra.mxu1 %v1857_v5  ;;  %v758_v4 = vld [vmem:[%s2865_s4 + $0xe8] sm:$0xff] (!%p1587_p6)  ;;  %v1897_v5 = vpack.c.bf16 (!%p1587_p6), %v743_v0, %v735_v41  ;;  %v1128_v59 = vld [vmem:[%s2867_s6 + $0x130] sm:$0xff] (!%p1587_p6)  ;;  %v1129_v61 = vld [vmem:[%s2867_s6 + $0x138] sm:$0xff] (!%p1587_p6)  ;;  %v1917_v0 = vpack.c.bf16 (!%p1587_p6), %v1097_v58, %v1096_v56 }
 0x124   : > { %2106 = vrcp.f32 %v599_v7  ;;  %1859 = vmatprep.subr.bf16.mxu1 %v2117_v23  ;;  %v644_v9 = vmul.f32 %v2097_v8, %v2281_v1  ;;  %v749_v7 = vld [vmem:[%s2865_s4 + $0xa0] sm:$0xff] (!%p1587_p6)  ;;  %v1115_v41 = vld [vmem:[%s2867_s6 + $0xc8] sm:$0xff] (!%p1587_p6)  ;;  %v1136_v25 = vld [vmem:[%s2867_s6 + $0x170] sm:$0xff] (!%p1587_p6) }
 0x125   : > { %v1860_v47 = vpack.c.bf16 %v642_v2, %v641_v45  ;;  %v750_v2 = vld [vmem:[%s2865_s4 + $0xa8] sm:$0xff] (!%p1587_p6)  ;;  %v757_v8 = vld [vmem:[%s2865_s4 + $0xe0] sm:$0xff] (!%p1587_p6)  ;;  %v752_v45 = vld [vmem:[%s2865_s4 + $0xb8] sm:$0xff] (!%p1587_p6) }
 0x126   : > { %v2099_v10 = vpop.eup %2098  ;;  %v1891_v6 = vpack.c.bf16 (!%p1587_p6), %v758_v4, %v750_v2  ;;  %v1949_v2 = vpack.c.bf16 (!%p1587_p6), %v1129_v61, %v1128_v59  ;;  %v1919_v4 = vpack.c.bf16 (!%p1587_p6), %v1115_v41, %v1114_v39  ;;  %v1137_v44 = vld [vmem:[%s2867_s6 + $0x178] sm:$0xff] (!%p1587_p6)  ;;  %v2650_v58 = vld [vmem:[%s2866_s5] sm:$0xff] (!%p1587_p6) }
 0x127   : > { %v2101_v12 = vpop.eup %2100  ;;  %v643_v14 = vmul.f32 %v2099_v10, %v2284_v3  ;;  %1861 = vmatpush3.bf16.msra.mxu1 %v1860_v47  ;;  %v751_v47 = vld [vmem:[%s2865_s4 + $0xb0] sm:$0xff] (!%p1587_p6)  ;;  %v1154_v41 = vld [vmem:[%s2867_s6 + $0x200] sm:$0xff] (!%p1587_p6) }
 0x128   : > { %v646_v55 = vmul.f32 %v2101_v12, %v2289_v11  ;;  %1862 = vmatprep.subr.bf16.mxu1 %v2117_v23  ;;  %v759_v10 = vld [vmem:[%s2865_s4 + $0xf0] sm:$0xff] (!%p1587_p6) }
 0x129   : > { %v2103_v15 = vpop.eup %2102  ;;  %v1863_v57 = vpack.c.bf16 %v644_v9, %v643_v14  ;;  %v760_v9 = vld [vmem:[%s2865_s4 + $0xf8] sm:$0xff] (!%p1587_p6)  ;;  %v1106_v14 = vld [vmem:[%s2867_s6 + $0x80] sm:$0xff] (!%p1587_p6) }
 0x12a   : > { %v645_v16 = vmul.f32 %v2103_v15, %v2292_v13  ;;  %v1899_v12 = vpack.c.bf16 (!%p1587_p6), %v760_v9, %v752_v45  ;;  %v1138_v15 = vld [vmem:[%s2867_s6 + $0x180] sm:$0xff] (!%p1587_p6)  ;;  %v1131_v45 = vld [vmem:[%s2867_s6 + $0x148] sm:$0xff] (!%p1587_p6)  ;;  %v1116_v9 = vld [vmem:[%s2867_s6 + $0xd0] sm:$0xff] (!%p1587_p6) }
 0x12b   : > { %1864 = vmatpush3.bf16.msra.mxu1 %v1863_v57  ;;  %v1893_v57 = vpack.c.bf16 (!%p1587_p6), %v757_v8, %v749_v7  ;;  %v1130_v7 = vld [vmem:[%s2867_s6 + $0x140] sm:$0xff] (!%p1587_p6) }
 0x12c   : > { %1865 = vmatprep.subr.bf16.mxu1 %v2117_v23  ;;  %v1866_v17 = vpack.c.bf16 %v646_v55, %v645_v16  ;;  %v1107_v55 = vld [vmem:[%s2867_s6 + $0x88] sm:$0xff] (!%p1587_p6) }
 0x12d   : > { %v2105_v1 = vpop.eup %2104  ;;  %v1139_v16 = vld [vmem:[%s2867_s6 + $0x188] sm:$0xff] (!%p1587_p6) }
 0x12e   : > { %v2107_v18 = vpop.eup %2106  ;;  %v648_v19 = vmul.f32 %v2105_v1, %v2298_v22  ;;  %v730_v22 = vld [vmem:[%s2865_s4 + $0x8] sm:$0xff] (!%p1587_p6)  ;;  %v1903_v1 = vpack.c.bf16 (!%p1587_p6), %v1107_v55, %v1106_v14  ;;  %v1953_v55 = vpack.c.bf16 (!%p1587_p6), %v1131_v45, %v1130_v7  ;;  %v1173_v7 = vld [vmem:[%s2867_s6 + $0x298] sm:$0xff] (!%p1587_p6) }
 0x12f   : > { %v647_v3 = vmul.f32 %v2107_v18, %v2302_v30  ;;  %1867 = vmatpush3.bf16.msra.mxu1 %v1866_v17  ;;  %v1901_v17 = vpack.c.bf16 (!%p1587_p6), %v759_v10, %v751_v47  ;;  %v1090_v18 = vld [vmem:[%s2867_s6] sm:$0xff] (!%p1587_p6)  ;;  %v1117_v47 = vld [vmem:[%s2867_s6 + $0xd8] sm:$0xff] (!%p1587_p6)  ;;  %v1148_v10 = vld [vmem:[%s2867_s6 + $0x1d0] sm:$0xff] (!%p1587_p6) }
 0x130   : > { %1868 = vmatprep.subr.bf16.mxu1 %v2117_v23  ;;  %v738_v23 = vld [vmem:[%s2865_s4 + $0x48] sm:$0xff] (!%p1587_p6) }
 0x131   : > { %v1869_v11 = vpack.c.bf16 %v648_v19, %v647_v3  ;;  %v1871_v30 = vpack.c.bf16 (!%p1587_p6), %v738_v23, %v730_v22  ;;  %v1091_v19 = vld [vmem:[%s2867_s6 + $0x8] sm:$0xff] (!%p1587_p6)  ;;  %v1122_v3 = vld [vmem:[%s2867_s6 + $0x100] sm:$0xff] (!%p1587_p6) }
 0x132   : > { %v1905_v22 = vpack.c.bf16 (!%p1587_p6), %v1091_v19, %v1090_v18  ;;  %v1133_v18 = vld [vmem:[%s2867_s6 + $0x158] sm:$0xff] (!%p1587_p6)  ;;  %v1118_v19 = vld [vmem:[%s2867_s6 + $0xe0] sm:$0xff] (!%p1587_p6) }
 0x133   : > { %1870 = vmatpush3.bf16.msra.mxu1 %v1869_v11  ;;  %1872 = vmatprep.subr.bf16.mxu0 (!%p1587_p6), %v1871_v30  ;;  %v1935_v11 = vpack.c.bf16 (!%p1587_p6), %v1139_v16, %v1138_v15  ;;  %v1092_v30 = vld [vmem:[%s2867_s6 + $0x10] sm:$0xff] (!%p1587_p6)  ;;  %v1923_v15 = vpack.c.bf16 (!%p1587_p6), %v1117_v47, %v1116_v9  ;;  %v1101_v16 = vld [vmem:[%s2867_s6 + $0x58] sm:$0xff] (!%p1587_p6) }
 0x134   : > { %1880 = vmatprep.subr.bf16.mxu1 (!%p1587_p6), %v1879_v37  ;;  %1874 = vmatpush1.bf16.msra.mxu0 (!%p1587_p6), %v1873_v27  ;;  %v1110_v37 = vld [vmem:[%s2867_s6 + $0xa0] sm:$0xff] (!%p1587_p6)  ;;  %v1111_v27 = vld [vmem:[%s2867_s6 + $0xa8] sm:$0xff] (!%p1587_p6)  ;;  %v1909_v42 = vpack.c.bf16 (!%p1587_p6), %v1093_v31, %v1092_v30  ;;  %v1204_v47 = vld [vmem:[%s2867_s6 + $0x390] sm:$0xff] (!%p1587_p6) }
 0x135   : > { %1876 = vmatprep.subr.bf16.mxu0 (!%p1587_p6), %v1875_v46  ;;  %v1911_v29 = vpack.c.bf16 (!%p1587_p6), %v1111_v27, %v1110_v37  ;;  %v1126_v46 = vld [vmem:[%s2867_s6 + $0x120] sm:$0xff] (!%p1587_p6)  ;;  %v1135_v30 = vld [vmem:[%s2867_s6 + $0x168] sm:$0xff] (!%p1587_p6)  ;;  %v1152_v37 = vld [vmem:[%s2867_s6 + $0x1f0] sm:$0xff] (!%p1587_p6) }
 0x136   : > { %1837 = vmatmul.mubr.f32.vlgmr.msra.gmra.mrb[0].mxu1 %v650_v20  ;;  %v1123_v20 = vld [vmem:[%s2867_s6 + $0x108] sm:$0xff] (!%p1587_p6) }
 0x137   : > { %941 = vmatprep.mubr.f32.mxu1 (!%p1587_p6), %v2120_v36  ;;  %1882 = vmatpush1.bf16.msra.mxu1 (!%p1587_p6), %v1881_v43  ;;  %v1937_v23 = vpack.c.bf16 (!%p1587_p6), %v1123_v20, %v1122_v3  ;;  %v1119_v3 = vld [vmem:[%s2867_s6 + $0xe8] sm:$0xff] (!%p1587_p6) }
 0x138   : > { %1884 = vmatprep.subr.bf16.mxu1 (!%p1587_p6), %v1883_v48  ;;  %1878 = vmatpush1.bf16.msra.mxu0 (!%p1587_p6), %v1877_v33  ;;  %v1943_v48 = vpack.c.bf16 (!%p1587_p6), %v1143_v40, %v1142_v38  ;;  %v1144_v33 = vld [vmem:[%s2867_s6 + $0x1b0] sm:$0xff] (!%p1587_p6)  ;;  %v1151_v20 = vld [vmem:[%s2867_s6 + $0x1e8] sm:$0xff] (!%p1587_p6)  ;;  %v1153_v38 = vld [vmem:[%s2867_s6 + $0x1f8] sm:$0xff] (!%p1587_p6) }
 0x139   : > { %1888 = vmatprep.subr.bf16.mxu0 (!%p1587_p6), %v1887_v60  ;;  %v1947_v60 = vpack.c.bf16 (!%p1587_p6), %v1145_v52, %v1144_v33  ;;  %v1104_v40 = vld [vmem:[%s2867_s6 + $0x70] sm:$0xff] (!%p1587_p6)  ;;  %v1203_v33 = vld [vmem:[%s2867_s6 + $0x388] sm:$0xff] (!%p1587_p6) }
 0x13b   : > { %1886 = vmatpush1.bf16.msra.mxu1 (!%p1587_p6), %v1885_v53  ;;  %v1945_v53 = vpack.c.bf16 (!%p1587_p6), %v1127_v49, %v1126_v46  ;;  %v1965_v46 = vpack.c.bf16 (!%p1587_p6), %v1137_v44, %v1136_v25  ;;  %v1171_v49 = vld [vmem:[%s2867_s6 + $0x288] sm:$0xff] (!%p1587_p6)  ;;  %v1209_v25 = vld [vmem:[%s2867_s6 + $0x3b8] sm:$0xff] (!%p1587_p6) }
 0x13c   : > { %1896 = vmatprep.subr.bf16.mxu1 (!%p1587_p6), %v1895_v63  ;;  %v1147_v63 = vld [vmem:[%s2867_s6 + $0x1c8] sm:$0xff] (!%p1587_p6) }
 0x206   : > { %727 = sbr.rel (%p1587_p6) target bundleno = 1000 (0x3e8), region = 60 }
 0x209   : > { %v717_v24 = vpop.f32.mrb[0].mxu1 }
 0x20a   : > { %v721_v13 = vadd.f32 %v717_v24, %v649_v21  ;;  %v1838_v26 = vpop.f32.mrb[1].mxu1  ;;  %v1108_v21 = vld [vmem:[%s2867_s6 + $0x90] sm:$0xff] (!%p1587_p6)  ;;  %v1109_v24 = vld [vmem:[%s2867_s6 + $0x98] sm:$0xff] (!%p1587_p6) }
 0x20b   : > { %v1141_v26 = vld [vmem:[%s2867_s6 + $0x198] sm:$0xff] (!%p1587_p6)  ;;  %v1907_v28 = vpack.c.bf16 (!%p1587_p6), %v1109_v24, %v1108_v21 }
 0x20c   : > { %723 = vst.msk [vmem:[#allocation2] sm:$0xf] %vm722_vm3, %v721_v13  ;;  %v1140_v13 = vld [vmem:[%s2867_s6 + $0x190] sm:$0xff] (!%p1587_p6) }
 0x20d   : > { %v1939_v34 = vpack.c.bf16 %v1141_v26, %v1140_v13  ;;  %v1927_v13 = vpack.c.bf16 %v1119_v3, %v1118_v19  ;;  %v1102_v26 = vld [vmem:[%s2867_s6 + $0x60] sm:$0xff]  ;;  %v1157_v19 = vld [vmem:[%s2867_s6 + $0x218] sm:$0xff]  ;;  %v1188_v3 = vld [vmem:[%s2867_s6 + $0x310] sm:$0xff] }
 0x213   : > { %v2382_v54 = vld [vmem:[#allocation2] sm:$0xf] }
 0x214   : > { %1588 = vmatmul.mubr.msk.f32.vlgmr.msra.gmra.mrb[0].mxu0 %vm343_vm1, %v2382_v54  ;;  %1589 = vmatmul.mubr.msk.f32.vlgmr.msra.gmra.mrb[0].mxu1 %vm343_vm1, %v2382_v54 }
 0x215   : > { %1890 = vmatpush1.bf16.msra.mxu0 %v1889_v62  ;;  %1898 = vmatpush1.bf16.msra.mxu1 %v1897_v5  ;;  %v1146_v62 = vld [vmem:[%s2867_s6 + $0x1c0] sm:$0xff] }
 0x216   : > { %1892 = vmatprep.subr.bf16.mxu0 %v1891_v6  ;;  %1900 = vmatprep.subr.bf16.mxu1 %v1899_v12  ;;  %v1098_v5 = vld [vmem:[%s2867_s6 + $0x40] sm:$0xff]  ;;  %v1099_v6 = vld [vmem:[%s2867_s6 + $0x48] sm:$0xff]  ;;  %v1951_v8 = vpack.c.bf16 %v1147_v63, %v1146_v62  ;;  %v1149_v12 = vld [vmem:[%s2867_s6 + $0x1d8] sm:$0xff] }
 0x217   : > { %1012 = vmatprep.mubr.f32.mxu0 %v2120_v36  ;;  %1083 = vmatprep.mubr.f32.mxu1 %v2120_v36  ;;  %v1125_v36 = vld [vmem:[%s2867_s6 + $0x118] sm:$0xff]  ;;  %v1921_v14 = vpack.c.bf16 %v1099_v6, %v1098_v5  ;;  %v1155_v62 = vld [vmem:[%s2867_s6 + $0x208] sm:$0xff]  ;;  %v1172_v6 = vld [vmem:[%s2867_s6 + $0x290] sm:$0xff] }
 0x218   : > { %v1941_v43 = vpack.c.bf16 %v1125_v36, %v1124_v32  ;;  %v1121_v36 = vld [vmem:[%s2867_s6 + $0xf8] sm:$0xff]  ;;  %v1969_v9 = vpack.c.bf16 %v1155_v62, %v1154_v41  ;;  %v1210_v41 = vld [vmem:[%s2867_s6 + $0x3c0] sm:$0xff]  ;;  %v1211_v62 = vld [vmem:[%s2867_s6 + $0x3c8] sm:$0xff] }
 0x219   : > { %1894 = vmatpush1.bf16.msra.mxu0 %v1893_v57  ;;  %1902 = vmatpush1.bf16.msra.mxu1 %v1901_v17  ;;  %v1100_v57 = vld [vmem:[%s2867_s6 + $0x50] sm:$0xff] }
 0x21a   : > { %1904 = vmatprep.subr.bf16.mxu0 %v1903_v1  ;;  %1936 = vmatprep.subr.bf16.mxu1 %v1935_v11  ;;  %v1132_v17 = vld [vmem:[%s2867_s6 + $0x150] sm:$0xff]  ;;  %v1955_v1 = vpack.c.bf16 %v1149_v12, %v1148_v10  ;;  %v1150_v11 = vld [vmem:[%s2867_s6 + $0x1e0] sm:$0xff]  ;;  %v1925_v21 = vpack.c.bf16 %v1101_v16, %v1100_v57  ;;  %v1205_v10 = vld [vmem:[%s2867_s6 + $0x398] sm:$0xff] }
 0x21b   : > { %v1957_v24 = vpack.c.bf16 %v1133_v18, %v1132_v17  ;;  %v1156_v18 = vld [vmem:[%s2867_s6 + $0x210] sm:$0xff] }
 0x21c   : > { %1590 = vmatmul.mubr.msk.f32.vlgmr.msra.gmra.mrb[2].mxu0 %vm343_vm1, %v2382_v54  ;;  %1591 = vmatmul.mubr.msk.f32.vlgmr.msra.gmra.mrb[2].mxu1 %vm343_vm1, %v2382_v54  ;;  %v1915_v54 = vpack.c.bf16 %v1113_v51, %v1112_v50  ;;  %v1202_v50 = vld [vmem:[%s2867_s6 + $0x380] sm:$0xff] }
 0x21d   : > { %1906 = vmatpush3.bf16.msra.mxu0 %v1905_v22  ;;  %1938 = vmatpush3.bf16.msra.mxu1 %v1937_v23  ;;  %v1103_v22 = vld [vmem:[%s2867_s6 + $0x68] sm:$0xff]  ;;  %v1959_v23 = vpack.c.bf16 %v1151_v20, %v1150_v11  ;;  %v1999_v52 = vpack.c.bf16 %v1203_v33, %v1202_v50  ;;  %v2003_v20 = vpack.c.bf16 %v1205_v10, %v1204_v47  ;;  %v1212_v47 = vld [vmem:[%s2867_s6 + $0x3d0] sm:$0xff]  ;;  %v1213_v10 = vld [vmem:[%s2867_s6 + $0x3d8] sm:$0xff] }
 0x21e   : > { %1908 = vmatprep.subr.bf16.mxu0 %v1907_v28  ;;  %1940 = vmatprep.subr.bf16.mxu1 %v1939_v34  ;;  %v1134_v28 = vld [vmem:[%s2867_s6 + $0x160] sm:$0xff]  ;;  %v1929_v31 = vpack.c.bf16 %v1103_v22, %v1102_v26  ;;  %v1120_v34 = vld [vmem:[%s2867_s6 + $0xf0] sm:$0xff]  ;;  %v1207_v22 = vld [vmem:[%s2867_s6 + $0x3a8] sm:$0xff] }
 0x21f   : > { %v1961_v32 = vpack.c.bf16 %v1135_v30, %v1134_v28  ;;  %v1931_v27 = vpack.c.bf16 %v1121_v36, %v1120_v34  ;;  %v1206_v26 = vld [vmem:[%s2867_s6 + $0x3a0] sm:$0xff]  ;;  %v1159_v34 = vld [vmem:[%s2867_s6 + $0x228] sm:$0xff] }
 0x220   : > { %v1190_v36 = vld [vmem:[%s2867_s6 + $0x320] sm:$0xff] }
 0x221   : > { %1910 = vmatpush3.bf16.msra.mxu0 %v1909_v42  ;;  %1942 = vmatpush3.bf16.msra.mxu1 %v1941_v43  ;;  %v1105_v42 = vld [vmem:[%s2867_s6 + $0x78] sm:$0xff]  ;;  %v1963_v43 = vpack.c.bf16 %v1153_v38, %v1152_v37  ;;  %v1191_v38 = vld [vmem:[%s2867_s6 + $0x328] sm:$0xff] }
 0x222   : > { %1912 = vmatprep.subr.bf16.mxu0 %v1911_v29  ;;  %1944 = vmatprep.subr.bf16.mxu1 %v1943_v48  ;;  %v1933_v29 = vpack.c.bf16 %v1105_v42, %v1104_v40  ;;  %v1170_v48 = vld [vmem:[%s2867_s6 + $0x280] sm:$0xff]  ;;  %v1176_v40 = vld [vmem:[%s2867_s6 + $0x2b0] sm:$0xff]  ;;  %v1177_v42 = vld [vmem:[%s2867_s6 + $0x2b8] sm:$0xff] }
 0x223   : > { %v1967_v51 = vpack.c.bf16 %v1171_v49, %v1170_v48  ;;  %v1979_v33 = vpack.c.bf16 %v1177_v42, %v1176_v40  ;;  %v1168_v42 = vld [vmem:[%s2867_s6 + $0x270] sm:$0xff] }
 0x225   : > { %1914 = vmatpush3.bf16.msra.mxu0 %v1913_v35  ;;  %1946 = vmatpush3.bf16.msra.mxu1 %v1945_v53  ;;  %v763_v35 = vlaneseq }
 0x226   : > { %1916 = vmatprep.subr.bf16.mxu0 %v1915_v54  ;;  %1948 = vmatprep.subr.bf16.mxu1 %v1947_v60 }
 0x227   : > { %v2643_v53 = vshrl.u32 %v763_v35, 7  ;;  %v1161_v35 = vld [vmem:[%s2867_s6 + $0x238] sm:$0xff] }
 0x229   : > { %1918 = vmatpush3.bf16.msra.mxu0 %v1917_v0  ;;  %1950 = vmatpush3.bf16.msra.mxu1 %v1949_v2  ;;  %v773_v54 = vsub.s32 2, %v2643_v53  ;;  %v769_v56 = vsub.s32 1, %v2643_v53  ;;  %v765_v59 = vsub.s32 0, %v2643_v53  ;;  %v777_v60 = vsub.s32 3, %v2643_v53  ;;  %v1186_v2 = vld [vmem:[%s2867_s6 + $0x300] sm:$0xff] }
 0x22a   : > { %1920 = vmatprep.subr.bf16.mxu0 %v1919_v4  ;;  %1952 = vmatprep.subr.bf16.mxu1 %v1951_v8  ;;  %v1187_v4 = vld [vmem:[%s2867_s6 + $0x308] sm:$0xff]  ;;  %v785_v57 = vsub.s32 5, %v2643_v53  ;;  %v793_v11 = vsub.s32 7, %v2643_v53 }
 0x22b   : > { %v774_v61 = vrot.slane %v2650_v58, %v773_v54  ;;  %v770_v39 = vrot.slane %v2650_v58, %v769_v56  ;;  %v766_v63 = vrot.slane %v2650_v58, %v765_v59  ;;  %v778_v0 = vrot.slane %v2650_v58, %v777_v60  ;;  %v1192_v54 = vld [vmem:[%s2867_s6 + $0x330] sm:$0xff]  ;;  %v1193_v60 = vld [vmem:[%s2867_s6 + $0x338] sm:$0xff] }
 0x22c   : > { %v786_v28 = vrot.slane %v2650_v58, %v785_v57  ;;  %v794_v37 = vrot.slane %v2650_v58, %v793_v11  ;;  %v1165_v57 = vld [vmem:[%s2867_s6 + $0x258] sm:$0xff]  ;;  %v1215_v11 = vld [vmem:[%s2867_s6 + $0x3e8] sm:$0xff] }
 0x22d   : > { %1922 = vmatpush3.bf16.msra.mxu0 %v1921_v14  ;;  %1954 = vmatpush3.bf16.msra.mxu1 %v1953_v55 }
 0x22e   : > { %1924 = vmatprep.subr.bf16.mxu0 %v1923_v15  ;;  %1956 = vmatprep.subr.bf16.mxu1 %v1955_v1  ;;  %v2001_v15 = vpack.c.bf16 %v1187_v4, %v1186_v2  ;;  %v1971_v1 = vpack.c.bf16 %v1173_v7, %v1172_v6  ;;  %v1162_v4 = vld [vmem:[%s2867_s6 + $0x240] sm:$0xff]  ;;  %v2015_v7 = vpack.c.bf16 %v1211_v62, %v1210_v41 }
 0x22f   : > { %v1194_v6 = vld [vmem:[%s2867_s6 + $0x340] sm:$0xff] }
 0x231   : > { %1926 = vmatpush3.bf16.msra.mxu0 %v1925_v21  ;;  %1958 = vmatpush3.bf16.msra.mxu1 %v1957_v24  ;;  %v1189_v21 = vld [vmem:[%s2867_s6 + $0x318] sm:$0xff]  ;;  %v1174_v24 = vld [vmem:[%s2867_s6 + $0x2a0] sm:$0xff] }
 0x232   : > { %1928 = vmatprep.subr.bf16.mxu0 %v1927_v13  ;;  %1960 = vmatprep.subr.bf16.mxu1 %v1959_v23  ;;  %v1175_v13 = vld [vmem:[%s2867_s6 + $0x2a8] sm:$0xff]  ;;  %v1973_v23 = vpack.c.bf16 %v1157_v19, %v1156_v18  ;;  %v2005_v30 = vpack.c.bf16 %v1189_v21, %v1188_v3  ;;  %v1182_v18 = vld [vmem:[%s2867_s6 + $0x2e0] sm:$0xff] }
 0x233   : > { %v1183_v19 = vld [vmem:[%s2867_s6 + $0x2e8] sm:$0xff]  ;;  %v1214_v3 = vld [vmem:[%s2867_s6 + $0x3e0] sm:$0xff] }
 0x235   : > { %1930 = vmatpush3.bf16.msra.mxu0 %v1929_v31  ;;  %1962 = vmatpush3.bf16.msra.mxu1 %v1961_v32  ;;  %v1975_v31 = vpack.c.bf16 %v1175_v13, %v1174_v24  ;;  %v1158_v32 = vld [vmem:[%s2867_s6 + $0x220] sm:$0xff]  ;;  %v1991_v24 = vpack.c.bf16 %v1183_v19, %v1182_v18 }
 0x236   : > { %1932 = vmatprep.subr.bf16.mxu0 %v1931_v27  ;;  %1964 = vmatprep.subr.bf16.mxu1 %v1963_v43  ;;  %v2007_v27 = vpack.c.bf16 %v1207_v22, %v1206_v26  ;;  %v1977_v48 = vpack.c.bf16 %v1159_v34, %v1158_v32  ;;  %v1166_v13 = vld [vmem:[%s2867_s6 + $0x260] sm:$0xff]  ;;  %v1167_v26 = vld [vmem:[%s2867_s6 + $0x268] sm:$0xff]  ;;  %v1216_v32 = vld [vmem:[%s2867_s6 + $0x3f0] sm:$0xff] }
 0x237   : > { %v1198_v22 = vld [vmem:[%s2867_s6 + $0x360] sm:$0xff]  ;;  %v1217_v34 = vld [vmem:[%s2867_s6 + $0x3f8] sm:$0xff] }
 0x239   : > { %1934 = vmatpush3.bf16.msra.mxu0 %v1933_v29  ;;  %1966 = vmatpush3.bf16.msra.mxu1 %v1965_v46  ;;  %v1208_v29 = vld [vmem:[%s2867_s6 + $0x3b0] sm:$0xff] }
 0x23a   : > { %1968 = vmatprep.subr.bf16.mxu0 %v1967_v51  ;;  %2000 = vmatprep.subr.bf16.mxu1 %v1999_v52  ;;  %v2009_v51 = vpack.c.bf16 %v1191_v38, %v1190_v36  ;;  %v1160_v52 = vld [vmem:[%s2867_s6 + $0x230] sm:$0xff]  ;;  %v2011_v59 = vpack.c.bf16 %v1209_v25, %v1208_v29  ;;  %v1993_v36 = vpack.c.bf16 %v1167_v26, %v1166_v13  ;;  %v781_v38 = vsub.s32 4, %v2643_v53  ;;  %v1169_v29 = vld [vmem:[%s2867_s6 + $0x278] sm:$0xff] }
 0x23b   : > { %v2027_v25 = vpack.c.bf16 %v1217_v34, %v1216_v32 }
 0x2e7   : > { %v872_v5 = vpop.f32.mrb[0].mxu0  ;;  %v943_v8 = vpop.f32.mrb[0].mxu1 }
 0x2e8   : > { %v874_v45 = vpop.f32.mrb[1].mxu0  ;;  %v944_v12 = vadd.f32 %v943_v8, %v774_v61  ;;  %v945_v55 = vpop.f32.mrb[1].mxu1  ;;  %v873_v16 = vadd.f32 %v872_v5, %v766_v63  ;;  %v1178_v61 = vld [vmem:[%s2867_s6 + $0x2c0] sm:$0xff]  ;;  %v1981_v63 = vpack.c.bf16 %v1161_v35, %v1160_v52  ;;  %v1163_v5 = vld [vmem:[%s2867_s6 + $0x248] sm:$0xff] }
 0x2e9   : > { %v875_v14 = vadd.f32 %v874_v45, %v770_v39  ;;  %v946_v17 = vadd.f32 %v945_v55, %v778_v0  ;;  %v1179_v39 = vld [vmem:[%s2867_s6 + $0x2c8] sm:$0xff]  ;;  %v2013_v0 = vpack.c.bf16 %v1193_v60, %v1192_v54  ;;  %v1180_v45 = vld [vmem:[%s2867_s6 + $0x2d0] sm:$0xff] }
 0x2ea   : > { %v1983_v2 = vpack.c.bf16 %v1179_v39, %v1178_v61  ;;  %v1195_v8 = vld [vmem:[%s2867_s6 + $0x348] sm:$0xff] }
 0x2eb   : > { %1289 = vmatprep.mubr.f32.mxu0 %v875_v14  ;;  %1359 = vmatprep.mubr.f32.mxu1 %v946_v17  ;;  %v2017_v14 = vpack.c.bf16 %v1195_v8, %v1194_v6  ;;  %v2019_v17 = vpack.c.bf16 %v1213_v10, %v1212_v47 }
 0x2ec   : > { %1290 = vmatmul.mubr.f32.vlgmr.msra.gmra.mrb[4].mxu0 %v873_v16  ;;  %1360 = vmatmul.mubr.f32.vlgmr.msra.gmra.mrb[4].mxu1 %v944_v12  ;;  %v1985_v12 = vpack.c.bf16 %v1163_v5, %v1162_v4  ;;  %v1196_v16 = vld [vmem:[%s2867_s6 + $0x350] sm:$0xff] }
 0x2ed   : > { %1970 = vmatpush3.bf16.msra.mxu0 %v1969_v9  ;;  %2002 = vmatpush3.bf16.msra.mxu1 %v2001_v15  ;;  %v1181_v9 = vld [vmem:[%s2867_s6 + $0x2d8] sm:$0xff]  ;;  %v1164_v15 = vld [vmem:[%s2867_s6 + $0x250] sm:$0xff] }
 0x2ee   : > { %1972 = vmatprep.subr.bf16.mxu0 %v1971_v1  ;;  %2004 = vmatprep.subr.bf16.mxu1 %v2003_v20  ;;  %v1987_v55 = vpack.c.bf16 %v1181_v9, %v1180_v45  ;;  %v1197_v1 = vld [vmem:[%s2867_s6 + $0x358] sm:$0xff]  ;;  %v1989_v20 = vpack.c.bf16 %v1165_v57, %v1164_v15 }
 0x2ef   : > { %v2728_v43 = vpop.f32.mrb[2].mxu0  ;;  %v2736_v46 = vpop.f32.mrb[2].mxu1  ;;  %v2021_v21 = vpack.c.bf16 %v1197_v1, %v1196_v16 }
 0x2f0   : > { %v1016_v44 = vpop.f32.mrb[3].mxu0  ;;  %v1087_v50 = vpop.f32.mrb[3].mxu1 }
 0x2f1   : > { %1974 = vmatpush3.bf16.msra.mxu0 %v1973_v23  ;;  %v1017_v49 = vadd.f32 %v1016_v44, %v786_v28  ;;  %2006 = vmatpush3.bf16.msra.mxu1 %v2005_v30  ;;  %v1088_v56 = vadd.f32 %v1087_v50, %v794_v37  ;;  %v2023_v23 = vpack.c.bf16 %v1215_v11, %v1214_v3  ;;  %v1199_v28 = vld [vmem:[%s2867_s6 + $0x368] sm:$0xff]  ;;  %v1184_v30 = vld [vmem:[%s2867_s6 + $0x2f0] sm:$0xff]  ;;  %v789_v37 = vsub.s32 6, %v2643_v53 }
 0x2f2   : > { %1976 = vmatprep.subr.bf16.mxu0 %v1975_v31  ;;  %2008 = vmatprep.subr.bf16.mxu1 %v2007_v27  ;;  %v1185_v31 = vld [vmem:[%s2867_s6 + $0x2f8] sm:$0xff]  ;;  %v2025_v27 = vpack.c.bf16 %v1199_v28, %v1198_v22  ;;  %v1200_v44 = vld [vmem:[%s2867_s6 + $0x370] sm:$0xff]  ;;  %v782_v50 = vrot.slane %v2650_v58, %v781_v38 }
 0x2f3   : > { %1429 = vmatprep.mubr.f32.mxu0 %v1017_v49  ;;  %1499 = vmatprep.mubr.f32.mxu1 %v1088_v56  ;;  %v1995_v40 = vpack.c.bf16 %v1185_v31, %v1184_v30  ;;  %v790_v53 = vrot.slane %v2650_v58, %v789_v37  ;;  %v1997_v49 = vpack.c.bf16 %v1169_v29, %v1168_v42  ;;  %v1592_v56 = vld [vmem:[%s2868_s7] ss:$0 sm:$0xff] }
 0x2f4   : > { %v1015_v52 = vadd.f32 %v2728_v43, %v782_v50 }
 0x2f5   : > { %1978 = vmatpush3.bf16.msra.mxu0 %v1977_v48  ;;  %2010 = vmatpush3.bf16.msra.mxu1 %v2009_v51  ;;  %v1201_v48 = vld [vmem:[%s2867_s6 + $0x378] sm:$0xff] }
 0x2f6   : > { %1980 = vmatprep.subr.bf16.mxu0 %v1979_v33  ;;  %2012 = vmatprep.subr.bf16.mxu1 %v2011_v59  ;;  %v2029_v51 = vpack.c.bf16 %v1201_v48, %v1200_v44  ;;  %v1086_v33 = vadd.f32 %v2736_v46, %v790_v53 }
 0x2f9   : > { %1982 = vmatpush3.bf16.msra.mxu0 %v1981_v63  ;;  %2014 = vmatpush3.bf16.msra.mxu1 %v2013_v0 }
 0x2fa   : > { %1984 = vmatprep.subr.bf16.mxu0 %v1983_v2  ;;  %2016 = vmatprep.subr.bf16.mxu1 %v2015_v7 }
 0x2fd   : > { %1986 = vmatpush3.bf16.msra.mxu0 %v1985_v12  ;;  %2018 = vmatpush3.bf16.msra.mxu1 %v2017_v14 }
 0x2fe   : > { %1988 = vmatprep.subr.bf16.mxu0 %v1987_v55  ;;  %2020 = vmatprep.subr.bf16.mxu1 %v2019_v17 }
 0x301   : > { %1990 = vmatpush3.bf16.msra.mxu0 %v1989_v20  ;;  %2022 = vmatpush3.bf16.msra.mxu1 %v2021_v21 }
 0x302   : > { %1992 = vmatprep.subr.bf16.mxu0 %v1991_v24  ;;  %2024 = vmatprep.subr.bf16.mxu1 %v2023_v23 }
 0x305   : > { %1994 = vmatpush3.bf16.msra.mxu0 %v1993_v36  ;;  %2026 = vmatpush3.bf16.msra.mxu1 %v2025_v27 }
 0x306   : > { %1996 = vmatprep.subr.bf16.mxu0 %v1995_v40  ;;  %2028 = vmatprep.subr.bf16.mxu1 %v2027_v25 }
 0x309   : > { %1998 = vmatpush3.bf16.msra.mxu0 %v1997_v49  ;;  %2030 = vmatpush3.bf16.msra.mxu1 %v2029_v51 }
 0x30c   : > { %1430 = vmatmul.mubr.f32.vlgmr.msra.gmra.mrb[6].mxu0 %v1015_v52  ;;  %1500 = vmatmul.mubr.f32.vlgmr.msra.gmra.mrb[6].mxu1 %v1086_v33 }
 0x3bf   : > { %v1664_v35 = vpop.f32.mrb[4].mxu0  ;;  %v1699_v54 = vpop.f32.mrb[4].mxu1 }
 0x3c0   : > { %v1665_v59 = vpop.f32.mrb[5].mxu0  ;;  %v1700_v58 = vpop.f32.mrb[5].mxu1 }
 0x3c1   : > { %v1666_v60 = vadd.f32 %v1665_v59, %v1664_v35  ;;  %v1701_v61 = vadd.f32 %v1700_v58, %v1699_v54 }
 0x3c3   : > { %v1292_v39 = vadd.f32 %v1666_v60, %v1592_v56 }
 0x3c5   : > { %v1362_v41 = vadd.f32 %v1701_v61, %v1292_v39 }
 0x3df   : > { %v1734_v62 = vpop.f32.mrb[6].mxu0  ;;  %v1769_v46 = vpop.f32.mrb[6].mxu1 }
 0x3e0   : > { %v1735_v63 = vpop.f32.mrb[7].mxu0  ;;  %v1770_v43 = vpop.f32.mrb[7].mxu1 }
 0x3e1   : > { %v1736_v0 = vadd.f32 %v1735_v63, %v1734_v62  ;;  %v1771_v2 = vadd.f32 %v1770_v43, %v1769_v46 }
 0x3e3   : > { %v1432_v4 = vadd.f32 %v1736_v0, %v1362_v41 }
 0x3e5   : > { %v1502_v5 = vadd.f32 %v1771_v2, %v1432_v4 }
 0x3e7   : > { %1505 = vst [vmem:[%s2869_s8] sm:$0xf] %v1502_v5 }
 0x3e8 PF: > { %s18_s27 = sadd.s32 1, %s2114_s27  }
 0x3e9   : > { %p15_p7 = scmp.ge.s32.totalorder %s18_s27, 4  }
 0x3eb   :  { %17 = sbr.rel (!%p15_p7) target bundleno = 1 (0x1), region = 89 }

</bundles_post_ra>
